<compile_context>
chip_gen: v7x
topology: tpu7x:2x2x1
jax: 0.10.0
libtpu: 0.0.40
codegen_flags: <defaults>
</compile_context>

<pallas_src>
import math

import jax
import jax.numpy as jnp
from jax.experimental import pallas as pl
from jax.experimental.pallas import tpu as pltpu

NUM_BINS = 6          # DownSampleToken.num_bins
NUM_HEADS = 1         # DownSampleToken.num_heads
KNN_K = 32            # DownSampleToken.K
BOLTZMANN_T = 0.1     # DownSampleToken.boltzmann_T
BN_EPS = 1e-5         # nn.BatchNorm default eps
RADIUS = 0.1          # group_args radius
NSAMPLE = 16          # group_args nsample
NB_PAD = 8            # bin tokens lane-padded to 8 inside [x | tok]


# ---------------------------------------------------------------------------
# Pallas kernel 1: DownSampleToken token-attention hot path (query-tiled).
# Per (batch, q-tile): fused k/v projection over [points | bin tokens], q over
# the query tile, scaled attention, independent softmax over point keys and bin
# tokens (matches the PyTorch split softmax), attended features in (C, TQ),
# pre-softmax bin energies, and partial (masked-sum, neighbor-count) rows for
# attention_point_score.
# ---------------------------------------------------------------------------
def _attn_kernel(xt_ref, xq_ref, mask_ref, w_ref,
                 f_ref, bins_ref, score_ref, cnt_ref):
    C = w_ref.shape[1]
    n_keys = mask_ref.shape[2]          # N (point keys)
    nb = bins_ref.shape[1]              # num bins

    w = w_ref[...]                      # (3C, C) bf16; q rows pre-scaled 1/sqrt(C)
    xt = xt_ref[0]                      # (C, N + NB_PAD) bf16 : [points | padded tokens]
    xq = xq_ref[0]                      # (C, TQ) bf16 : this q tile's columns of x

    # Projections: q only over the query tile; k/v in ONE fused MXU pass over
    # [points | tokens] (token projection folded into the main matmul).
    q = jnp.dot(w[:C], xq, preferred_element_type=jnp.float32).astype(jnp.bfloat16)  # (C, TQ)
    kv = jnp.dot(w[C:], xt, preferred_element_type=jnp.float32)                      # (2C, N+8)
    k_x = kv[:C, :n_keys].astype(jnp.bfloat16)               # (C, N)
    v_x = kv[C:, :n_keys].astype(jnp.bfloat16)               # (C, N)
    k_t = kv[:C, n_keys:n_keys + nb].astype(jnp.bfloat16)    # (C, nb)
    v_t = kv[C:, n_keys:n_keys + nb].astype(jnp.bfloat16)    # (C, nb)

    # Energies in transpose-free orientations (scale already folded into w_q).
    e_pts = jax.lax.dot_general(q, k_x, (((0,), (0,)), ((), ())),
                                preferred_element_type=jnp.float32)     # (TQ, N)
    e_bins = jax.lax.dot_general(k_t, q, (((0,), (0,)), ((), ())),
                                 preferred_element_type=jnp.float32)    # (nb, TQ) lane-dense

    # Softmax over point keys: explicit exp + EUP reciprocal (no VALU divide).
    m_pts = jnp.max(e_pts, axis=-1, keepdims=True)
    p_pts = jnp.exp(e_pts - m_pts)
    attn_pts = p_pts * pl.reciprocal(jnp.sum(p_pts, axis=-1, keepdims=True),
                                     approx=True)                        # (TQ, N)

    # Softmax over the bin tokens (axis 0 of (nb, TQ)).
    m_b = jnp.max(e_bins, axis=0, keepdims=True)
    p_b = jnp.exp(e_bins - m_b)
    attn_bins = p_b * pl.reciprocal(jnp.sum(p_b, axis=0, keepdims=True),
                                    approx=True)                         # (nb, TQ)

    # Attended features directly in (C, TQ); point and token value streams
    # summed (matches concatenated attention_map @ v in the PyTorch original).
    v_down = (jax.lax.dot_general(v_x, attn_pts.astype(jnp.bfloat16),
                                  (((1,), (1,)), ((), ())),
                                  preferred_element_type=jnp.float32)
              + jnp.dot(v_t, attn_bins.astype(jnp.bfloat16),
                        preferred_element_type=jnp.float32))             # (C, TQ)
    f_ref[...] = v_down.astype(f_ref.dtype).reshape(f_ref.shape)
    bins_ref[...] = e_bins.reshape(bins_ref.shape)        # PRE-softmax bin energies

    # Partial sums for attention_point_score: reduce over this tile's queries.
    # Exact normalization (sum / cnt^2) is done outside on the reduced vectors.
    mask_f = mask_ref[0].astype(jnp.float32)               # (TQ, N)
    score_ref[...] = jnp.sum(attn_pts * mask_f, axis=0,
                             keepdims=True).reshape(score_ref.shape)
    cnt_ref[...] = jnp.sum(mask_f, axis=0, keepdims=True).reshape(cnt_ref.shape)


def token_attention(xt, x, knn_mask, w_qkv, tq):
    """xt: (B,C,N+NB_PAD) bf16 [points|padded tokens]; x: (B,C,N) bf16;
    knn_mask: (B,N,N) int8; w_qkv: (3C,C) bf16 (q rows pre-scaled 1/sqrt(C))."""
    B, C, N = x.shape
    Np = xt.shape[2]
    nb = NUM_BINS
    assert N % tq == 0
    nqt = N // tq
    return pl.pallas_call(
        _attn_kernel,
        out_shape=(jax.ShapeDtypeStruct((B, C, N), jnp.bfloat16),       # f_att
                   jax.ShapeDtypeStruct((B, nb, N), jnp.float32),       # bin energies
                   jax.ShapeDtypeStruct((B, nqt, 1, N), jnp.float32),   # partial masked sums
                   jax.ShapeDtypeStruct((B, nqt, 1, N), jnp.float32)),  # partial neighbor counts
        grid=(B, nqt),
        in_specs=[pl.BlockSpec((1, C, Np), lambda b, q: (b, 0, 0)),     # resident per batch
                  pl.BlockSpec((1, C, tq), lambda b, q: (b, 0, q)),     # query-tile columns
                  pl.BlockSpec((1, tq, N), lambda b, q: (b, q, 0)),     # int8 knn rows
                  pl.BlockSpec((3 * C, C), lambda b, q: (0, 0))],
        out_specs=(pl.BlockSpec((1, C, tq), lambda b, q: (b, 0, q)),
                   pl.BlockSpec((1, nb, tq), lambda b, q: (b, 0, q)),
                   pl.BlockSpec((1, 1, 1, N), lambda b, q: (b, q, 0, 0)),
                   pl.BlockSpec((1, 1, 1, N), lambda b, q: (b, q, 0, 0))),
        compiler_params=pltpu.CompilerParams(
            dimension_semantics=("parallel", "parallel")),
    )(xt, x, knn_mask, w_qkv)


# ---------------------------------------------------------------------------
# Pallas kernel 2: SetAbstraction 1x1 conv (BN scale folded) + bias + ReLU +
# max over nsample neighbors.  Flipped orientation: (Cout,Cin) x (Cin,TM) with
# a running max over the nsample axis, output written lane-dense as
# (B, Cout, M) — no post-kernel transpose, no full (S, rows, Cout) buffer.
# ---------------------------------------------------------------------------
def _conv_pool_kernel(fj_ref, w_ref, bias_ref, out_ref):
    S = fj_ref.shape[1]
    w = w_ref[...]                       # (Cout, Cin) bf16, BN scale folded
    bias = bias_ref[...]                 # (Cout, 1) f32

    def body(s, acc):
        y = jnp.dot(w, fj_ref[0, s], preferred_element_type=jnp.float32)  # (Cout, TM)
        return jnp.maximum(acc, jnp.maximum(y + bias, 0.0))

    # ReLU output is >= 0, so a zero init equals the true max over neighbors.
    out = jax.lax.fori_loop(0, S, body,
                            jnp.zeros(out_ref.shape[1:], jnp.float32),
                            unroll=True)
    out_ref[...] = out.reshape(out_ref.shape)


def grouped_conv_pool(fj, w_eff, bias, tile_m):
    """fj: (B, S, Cin, M) bf16; w_eff: (Cout, Cin) bf16 (BN scale folded);
    bias: (Cout, 1) f32.  Returns (B, Cout, M) f32."""
    B, S, Cin, M = fj.shape
    Cout = w_eff.shape[0]
    assert M % tile_m == 0
    return pl.pallas_call(
        _conv_pool_kernel,
        out_shape=jax.ShapeDtypeStruct((B, Cout, M), jnp.float32),
        grid=(B, M // tile_m),
        in_specs=[pl.BlockSpec((1, S, Cin, tile_m), lambda b, mt: (b, 0, 0, mt)),
                  pl.BlockSpec((Cout, Cin), lambda b, mt: (0, 0)),
                  pl.BlockSpec((Cout, 1), lambda b, mt: (0, 0))],
        out_specs=pl.BlockSpec((1, Cout, tile_m), lambda b, mt: (b, 0, mt)),
        compiler_params=pltpu.CompilerParams(
            dimension_semantics=("parallel", "parallel")),
    )(fj, w_eff, bias)


# ---------------------------------------------------------------------------
# Glue (plain JAX): KNN mask, bin partitioning, bin allocation, sampling,
# ball-query grouping.  Small / control-heavy pieces.
# ---------------------------------------------------------------------------
def neighbor_mask_jax(x, k):
    """x: (B, C, N) -> int8 mask (B, N, N); mask[b,n,m]=1 iff m in kNN(n).
    Matches PyTorch knn(): +inf added to the diagonal of the NEGATED distance,
    so each point always selects itself (self INCLUDED, as in the original)."""
    pcd = jnp.transpose(x, (0, 2, 1))                       # (B, N, C)
    a_mean = jnp.mean(pcd, axis=1, keepdims=True)
    a = pcd - a_mean
    a_std = jnp.mean(jnp.std(a, axis=1, keepdims=True, ddof=1), axis=2, keepdims=True)
    a = a / a_std
    # ||a_i - a_j||^2 via matmul form: no (B, N, N, C) broadcast intermediate.
    sq = jnp.sum(a * a, axis=-1)                            # (B, N)
    d2 = sq[:, :, None] + sq[:, None, :] - 2.0 * jnp.einsum('bnc,bmc->bnm', a, a)
    pdist = -jnp.sqrt(jnp.maximum(d2, 0.0))
    N = pdist.shape[1]
    pdist = pdist + jnp.where(jnp.eye(N, dtype=bool), jnp.inf, 0.0)[None]
    _, idx = jax.lax.top_k(pdist, k)                        # (B, N, K)
    rows = jnp.arange(N)[:, None]
    # Scatter instead of one_hot(idx, N).max -> no (B, N, K, N) intermediate.
    mask = jax.vmap(lambda ii: jnp.zeros((N, N), jnp.int8).at[rows, ii].set(1))(idx)
    return mask


def bin_partition_jax(score, num_bins):
    # score: (B, 1, N).  Matches PyTorch: eps added AFTER the division, global
    # (over-batch) quantile boundaries, unbiased=False std.
    B, H, N = score.shape
    s = (score - jnp.mean(score, axis=2, keepdims=True)) / \
        jnp.std(score, axis=2, keepdims=True) + 1e-8
    s = s.reshape(B, H, N, 1)
    n_scores = s.size
    b_idx = (jnp.arange(1, num_bins) / num_bins * n_scores).astype(jnp.int32)
    sorted_scores = -jnp.sort(-s.reshape(-1))               # descending
    bb = sorted_scores[b_idx]
    inf = jnp.array([jnp.inf], dtype=s.dtype)
    upper = jnp.concatenate([inf, bb]).reshape(1, 1, 1, num_bins)
    lower = jnp.concatenate([bb, -inf]).reshape(1, 1, 1, num_bins)
    mask = (s < upper) & (s >= lower)                        # (B, 1, N, num_bins)
    return (upper, lower), mask


def bin_weights_jax(bins_nbN, bin_mask):
    # bins_nbN: (B, nb, N) PRE-softmax bin energies (as in the PyTorch original);
    # bin_mask: (B, 1, N, nb) bool.
    mask_nbN = jnp.transpose(bin_mask[:, 0], (0, 2, 1)).astype(bins_nbN.dtype)  # (B, nb, N)
    cnt = jnp.sum(mask_nbN, axis=2) + 1e-8
    bw_before = jnp.sum(bins_nbN * mask_nbN, axis=2) / cnt   # (B, nb)
    return jnp.maximum(bw_before, 0.0), bw_before            # mean_relu order


def calculate_num_points_to_choose_jax(total, bin_prob, max_num_points):
    B, nb = bin_prob.shape
    maxf = max_num_points.astype(bin_prob.dtype)
    prob = bin_prob * maxf + 1e-10
    chosen = jnp.zeros_like(prob)
    for _ in range(nb):
        denom = jnp.sum(prob, axis=1, keepdims=True)
        prob = prob / jnp.where(denom == 0, 1.0, denom)
        n_left = total - jnp.sum(chosen, axis=1, keepdims=True)
        chosen = chosen + prob * n_left
        chosen = jnp.where(chosen >= maxf, maxf, chosen)
        prob = prob * jnp.where(chosen >= maxf, 0.0, 1.0)
    chosen = chosen.astype(jnp.int32)
    deficit = total - jnp.sum(chosen, axis=1)                # (B,)
    slot = jnp.argmax(max_num_points - chosen, axis=1)       # (B,)
    chosen = chosen + jax.nn.one_hot(slot, nb, dtype=jnp.int32) * deficit[:, None]
    return chosen


def generating_downsampled_index_jax(key, M, score, bin_mask, boltzmann_t, k_choose):
    # bin_sample_mode == 'random'
    # TODO(synk): torch.multinomial(replacement=False) reimplemented via the
    # Gumbel top-k trick; same distribution, different RNG stream than PyTorch.
    B, _, N, nb = bin_mask.shape
    s = (score - jnp.mean(score, axis=2, keepdims=True)) / \
        jnp.std(score, axis=2, keepdims=True)
    s = jnp.tanh(s)
    probs = jnp.exp(s[..., None] / boltzmann_t) * bin_mask.astype(s.dtype)  # (B,1,N,nb)
    probs = probs / jnp.sum(probs, axis=2, keepdims=True)
    probs = jnp.where(jnp.isnan(probs), 1e-8, probs)[:, 0]                   # (B, N, nb)
    probs = jnp.transpose(probs, (0, 2, 1)).reshape(B * nb, N)
    g = jax.random.gumbel(key, probs.shape, dtype=probs.dtype)
    logp = jnp.where(probs > 0, jnp.log(jnp.maximum(probs, 1e-30)), -jnp.inf)
    _, samp = jax.lax.top_k(logp + g, M)                                     # (B*nb, M)
    samp = samp.reshape(B, nb, M)
    valid = jnp.arange(M)[None, None, :] < k_choose[:, :, None]              # (B, nb, M)
    flat_idx = samp.reshape(B, nb * M)
    flat_valid = valid.reshape(B, nb * M)
    order = jnp.argsort(jnp.logical_not(flat_valid), axis=1, stable=True)
    idx_down = jnp.take_along_axis(flat_idx, order, axis=1)[:, :M]           # (B, M)
    return idx_down


def ballquery_group_jax(new_p, p, f, radius, nsample):
    # TODO(synk): create_grouper is external to the given source; this follows
    # openpoints QueryAndGroup(ballquery) semantics (no dp normalization).
    B, M, _ = new_p.shape
    N = p.shape[1]
    d2 = (jnp.sum(new_p * new_p, -1)[:, :, None] + jnp.sum(p * p, -1)[:, None, :]
          - 2.0 * jnp.einsum('bmc,bnc->bmn', new_p, p))                      # (B, M, N)
    within = d2 < radius * radius
    ar = jnp.arange(N)[None, None, :]
    order = jnp.argsort(jnp.where(within, ar, N + ar), axis=-1)[:, :, :nsample]
    cnt = jnp.sum(within, axis=-1)                                           # (B, M)
    first = order[:, :, :1]
    pos = jnp.arange(nsample)[None, None, :]
    idx = jnp.where(pos < jnp.maximum(cnt, 1)[:, :, None], order, first)
    grouped_xyz = jax.vmap(lambda pts, ii: pts[ii])(p, idx)                  # (B, M, S, 3)
    dp = grouped_xyz - new_p[:, :, None, :]
    f_t = jnp.transpose(f, (0, 2, 1))                                        # (B, N, C)
    fj = jax.vmap(lambda feats, ii: feats[ii])(f_t, idx)                     # (B, M, S, C)
    return dp, fj


# ---------------------------------------------------------------------------
# Full SetAbstraction forward (is_head=False, stride=2, feature_type='dp_fj',
# use_res=False, layers=1).
# ---------------------------------------------------------------------------
def set_abstraction_forward(params, p, f, sample_key):
    B, C, N = f.shape
    M = N // 2                                               # DownSampleToken: M = N // 2
    nb = NUM_BINS

    # --- DownSampleToken (bin_mode='token', bin_sample_mode='random') ---
    # Fold 1/sqrt(C) into wq; stack q/k/v weights (one (3C,C) parameter).
    w_qkv = jnp.concatenate(
        [params["wq"] / math.sqrt(C), params["wk"], params["wv"]],
        axis=0).astype(jnp.bfloat16)                                         # (3C, C)
    tok = params["bin_tokens"][0]                                            # (C, nb)
    tok_pad = jnp.pad(tok, ((0, 0), (0, NB_PAD - nb)))                       # (C, 8)
    xt = jnp.concatenate(
        [f, jnp.broadcast_to(tok_pad[None], (B, C, NB_PAD))],
        axis=2).astype(jnp.bfloat16)                                         # (B, C, N+8)
    knn_mask = neighbor_mask_jax(f, KNN_K)                                   # (B, N, N) int8

    tq = min(256, N)
    f_att, bins_nbN, score_part, cnt_part = token_attention(
        xt, f.astype(jnp.bfloat16), knn_mask, w_qkv, tq)

    # Exact score normalization (avoids squared approx-reciprocal error).
    cnt = jnp.sum(cnt_part[:, :, 0, :], axis=1) + 1e-8                        # (B, N)
    score = (jnp.sum(score_part[:, :, 0, :], axis=1) / cnt / cnt)[:, None, :]  # (B, 1, N)
    # (+1e-8 in cnt makes the PyTorch isnan->0 guard a no-op.)

    _, bin_mask = bin_partition_jax(score, nb)
    bin_weights, _ = bin_weights_jax(bins_nbN, bin_mask)
    max_num_points = jnp.sum(bin_mask[:, 0], axis=1).astype(jnp.int32)        # (B, nb)
    k_choose = calculate_num_points_to_choose_jax(M, bin_weights, max_num_points)
    idx_down = generating_downsampled_index_jax(
        sample_key, M, score, bin_mask, BOLTZMANN_T, k_choose)                # (B, M)

    # --- SetAbstraction body ---
    new_p = jax.vmap(lambda pts, ii: pts[ii])(p, idx_down)                    # (B, M, 3)
    dp, fj = ballquery_group_jax(new_p, p, f_att, RADIUS, NSAMPLE)
    fj_agg = jnp.concatenate([dp.astype(jnp.bfloat16),
                              fj.astype(jnp.bfloat16)], axis=-1)              # (B, M, S, 3+C)
    fj_k = jnp.transpose(fj_agg, (0, 2, 3, 1))                                # (B, S, Cin, M)
    # Fold BN scale into the conv weight (parameter fold); bias stays separate.
    w_eff = (params["w_conv"] * params["bn_scale"][:, None]).astype(jnp.bfloat16)  # (Cout, Cin)
    bias = params["bn_bias"][:, None]                                         # (Cout, 1)
    tile_m = min(512, M)
    f_out = grouped_conv_pool(fj_k, w_eff, bias, tile_m)                      # (B, Cout, M)
    return new_p, f_out


if __name__ == "__main__":
    B, C_in, C_out, N = 2, 16, 32, 64

    key = jax.random.PRNGKey(0)
    kp, kf, kq, kk_, kv, kt, kc, ks = jax.random.split(key, 8)

    p = jax.random.uniform(kp, (B, N, 3), dtype=jnp.float32)
    f = jax.random.normal(kf, (B, C_in, N), dtype=jnp.float32)

    # TODO(synk): BatchNorm uses eval-mode default stats (mean=0, var=1, gamma=1,
    # beta=0) since no checkpoint is loaded.
    params = dict(
        wq=jax.random.normal(kq, (C_in, C_in), jnp.float32) / math.sqrt(C_in),
        wk=jax.random.normal(kk_, (C_in, C_in), jnp.float32) / math.sqrt(C_in),
        wv=jax.random.normal(kv, (C_in, C_in), jnp.float32) / math.sqrt(C_in),
        bin_tokens=jax.random.normal(kt, (1, C_in, NUM_BINS), jnp.float32) / math.sqrt(C_in),
        w_conv=jax.random.normal(kc, (C_out, 3 + C_in), jnp.float32) / math.sqrt(3 + C_in),
        bn_scale=jnp.ones((C_out,), jnp.float32) / jnp.sqrt(1.0 + BN_EPS),
        bn_bias=jnp.zeros((C_out,), jnp.float32),
    )

    new_p, f_out = jax.jit(set_abstraction_forward)(params, p, f, ks)
    jax.block_until_ready((new_p, f_out))

    assert new_p.shape == (B, N // 2, 3), new_p.shape
    assert f_out.shape == (B, C_out, N // 2), f_out.shape
    assert bool(jnp.all(jnp.isfinite(new_p))) and bool(jnp.all(jnp.isfinite(f_out)))
    print("KERNEL_OK")
</pallas_src>

<mosaic_0001>
module attributes {stable_mosaic.version = 11 : i64} {
  func.func @_attn_kernel(%arg0: i32, %arg1: i32, %arg2: memref<1x16x72xbf16, #tpu.memory_space<vmem>>, %arg3: memref<1x16x64xbf16, #tpu.memory_space<vmem>>, %arg4: memref<1x64x64xi8, #tpu.memory_space<vmem>>, %arg5: memref<48x16xbf16, #tpu.memory_space<vmem>>, %arg6: memref<1x16x64xbf16, #tpu.memory_space<vmem>>, %arg7: memref<1x6x64xf32, #tpu.memory_space<vmem>>, %arg8: memref<1x1x1x64xf32, #tpu.memory_space<vmem>>, %arg9: memref<1x1x1x64xf32, #tpu.memory_space<vmem>>) attributes {dimension_semantics = [#tpu.dimension_semantics<parallel>, #tpu.dimension_semantics<parallel>], iteration_bounds = array<i64: 2, 1>, scalar_prefetch = 0 : i64, scratch_operands = 0 : i64, tpu.core_type = #tpu.core_type<tc>, window_params = [{transform_indices = @transform_0, window_bounds = array<i64: 1, 16, 72>}, {transform_indices = @transform_1, window_bounds = array<i64: 1, 16, 64>}, {transform_indices = @transform_2, window_bounds = array<i64: 1, 64, 64>}, {pipeline_mode = #tpu.pipeline_mode<synchronous>, transform_indices = @transform_3, window_bounds = array<i64: 48, 16>}, {transform_indices = @transform_4, window_bounds = array<i64: 1, 16, 64>}, {transform_indices = @transform_5, window_bounds = array<i64: 1, 6, 64>}, {transform_indices = @transform_6, window_bounds = array<i64: 1, 1, 1, 64>}, {transform_indices = @transform_7, window_bounds = array<i64: 1, 1, 1, 64>}]} {
    %c0 = arith.constant 0 : index
    %c0_0 = arith.constant 0 : index
    %0 = vector.load %arg5[%c0, %c0_0] : memref<48x16xbf16, #tpu.memory_space<vmem>>, vector<48x16xbf16>
    %c0_1 = arith.constant 0 : index
    %c0_2 = arith.constant 0 : index
    %c0_3 = arith.constant 0 : index
    %1 = vector.load %arg2[%c0_1, %c0_2, %c0_3] : memref<1x16x72xbf16, #tpu.memory_space<vmem>>, vector<1x16x72xbf16>
    %2 = vector.shape_cast %1 : vector<1x16x72xbf16> to vector<16x72xbf16>
    %c0_4 = arith.constant 0 : index
    %c0_5 = arith.constant 0 : index
    %c0_6 = arith.constant 0 : index
    %3 = vector.load %arg3[%c0_4, %c0_5, %c0_6] : memref<1x16x64xbf16, #tpu.memory_space<vmem>>, vector<1x16x64xbf16>
    %4 = vector.shape_cast %3 : vector<1x16x64xbf16> to vector<16x64xbf16>
    %5 = vector.extract_strided_slice %0 {offsets = [0, 0], sizes = [16, 16], strides = [1, 1]} : vector<48x16xbf16> to vector<16x16xbf16>
    %cst = arith.constant dense<0.000000e+00> : vector<16x64xf32>
    %6 = tpu.matmul %5, %4, %cst {dimension_numbers = #tpu.dot_dimension_numbers<[1], [0], [0], [1], [0, 0, 1, 1], [], []>} : vector<16x16xbf16>, vector<16x64xbf16>, vector<16x64xf32> -> vector<16x64xf32>
    %7 = arith.truncf %6 : vector<16x64xf32> to vector<16x64xbf16>
    %8 = vector.extract_strided_slice %0 {offsets = [16, 0], sizes = [32, 16], strides = [1, 1]} : vector<48x16xbf16> to vector<32x16xbf16>
    %cst_7 = arith.constant dense<0.000000e+00> : vector<32x72xf32>
    %9 = tpu.matmul %8, %2, %cst_7 {dimension_numbers = #tpu.dot_dimension_numbers<[1], [0], [0], [1], [0, 0, 1, 1], [], []>} : vector<32x16xbf16>, vector<16x72xbf16>, vector<32x72xf32> -> vector<32x72xf32>
    %10 = vector.extract_strided_slice %9 {offsets = [0, 0], sizes = [16, 64], strides = [1, 1]} : vector<32x72xf32> to vector<16x64xf32>
    %11 = arith.truncf %10 : vector<16x64xf32> to vector<16x64xbf16>
    %12 = vector.extract_strided_slice %9 {offsets = [16, 0], sizes = [16, 64], strides = [1, 1]} : vector<32x72xf32> to vector<16x64xf32>
    %13 = arith.truncf %12 : vector<16x64xf32> to vector<16x64xbf16>
    %14 = vector.extract_strided_slice %9 {offsets = [0, 64], sizes = [16, 6], strides = [1, 1]} : vector<32x72xf32> to vector<16x6xf32>
    %15 = arith.truncf %14 : vector<16x6xf32> to vector<16x6xbf16>
    %16 = vector.extract_strided_slice %9 {offsets = [16, 64], sizes = [16, 6], strides = [1, 1]} : vector<32x72xf32> to vector<16x6xf32>
    %17 = arith.truncf %16 : vector<16x6xf32> to vector<16x6xbf16>
    %cst_8 = arith.constant dense<0.000000e+00> : vector<64x64xf32>
    %18 = tpu.matmul %7, %11, %cst_8 {dimension_numbers = #tpu.dot_dimension_numbers<[0], [0], [1], [1], [0, 1, 1, 1], [], []>} : vector<16x64xbf16>, vector<16x64xbf16>, vector<64x64xf32> -> vector<64x64xf32>
    %cst_9 = arith.constant dense<0.000000e+00> : vector<6x64xf32>
    %19 = tpu.matmul %15, %7, %cst_9 {dimension_numbers = #tpu.dot_dimension_numbers<[0], [0], [1], [1], [0, 1, 1, 1], [], []>} : vector<16x6xbf16>, vector<16x64xbf16>, vector<6x64xf32> -> vector<6x64xf32>
    %cst_10 = arith.constant dense<0xFF800000> : vector<64xf32>
    %20 = vector.multi_reduction <maximumf>, %18, %cst_10 [1] : vector<64x64xf32> to vector<64xf32>
    %21 = vector.shape_cast %20 : vector<64xf32> to vector<64x1xf32>
    %22 = vector.broadcast %21 : vector<64x1xf32> to vector<64x64xf32>
    %23 = arith.subf %18, %22 : vector<64x64xf32>
    %24 = math.exp %23 : vector<64x64xf32>
    %cst_11 = arith.constant dense<0.000000e+00> : vector<64xf32>
    %25 = vector.multi_reduction <add>, %24, %cst_11 [1] : vector<64x64xf32> to vector<64xf32>
    %26 = vector.shape_cast %25 : vector<64xf32> to vector<64x1xf32>
    %27 = tpu.reciprocal %26 {approx = true} : vector<64x1xf32> -> vector<64x1xf32>
    %28 = vector.broadcast %27 : vector<64x1xf32> to vector<64x64xf32>
    %29 = arith.mulf %24, %28 : vector<64x64xf32>
    %cst_12 = arith.constant dense<0xFF800000> : vector<64xf32>
    %30 = vector.multi_reduction <maximumf>, %19, %cst_12 [0] : vector<6x64xf32> to vector<64xf32>
    %31 = vector.shape_cast %30 : vector<64xf32> to vector<1x64xf32>
    %32 = vector.broadcast %31 : vector<1x64xf32> to vector<6x64xf32>
    %33 = arith.subf %19, %32 : vector<6x64xf32>
    %34 = math.exp %33 : vector<6x64xf32>
    %cst_13 = arith.constant dense<0.000000e+00> : vector<64xf32>
    %35 = vector.multi_reduction <add>, %34, %cst_13 [0] : vector<6x64xf32> to vector<64xf32>
    %36 = vector.shape_cast %35 : vector<64xf32> to vector<1x64xf32>
    %37 = tpu.reciprocal %36 {approx = true} : vector<1x64xf32> -> vector<1x64xf32>
    %38 = vector.broadcast %37 : vector<1x64xf32> to vector<6x64xf32>
    %39 = arith.mulf %34, %38 : vector<6x64xf32>
    %40 = arith.truncf %29 : vector<64x64xf32> to vector<64x64xbf16>
    %cst_14 = arith.constant dense<0.000000e+00> : vector<16x64xf32>
    %41 = tpu.matmul %13, %40, %cst_14 {dimension_numbers = #tpu.dot_dimension_numbers<[1], [1], [0], [0], [0, 0, 1, 0], [], []>} : vector<16x64xbf16>, vector<64x64xbf16>, vector<16x64xf32> -> vector<16x64xf32>
    %42 = arith.truncf %39 : vector<6x64xf32> to vector<6x64xbf16>
    %cst_15 = arith.constant dense<0.000000e+00> : vector<16x64xf32>
    %43 = tpu.matmul %17, %42, %cst_15 {dimension_numbers = #tpu.dot_dimension_numbers<[1], [0], [0], [1], [0, 0, 1, 1], [], []>} : vector<16x6xbf16>, vector<6x64xbf16>, vector<16x64xf32> -> vector<16x64xf32>
    %44 = arith.addf %41, %43 : vector<16x64xf32>
    %45 = arith.truncf %44 : vector<16x64xf32> to vector<16x64xbf16>
    %46 = vector.shape_cast %45 : vector<16x64xbf16> to vector<1x16x64xbf16>
    %c0_16 = arith.constant 0 : index
    %c0_17 = arith.constant 0 : index
    %c0_18 = arith.constant 0 : index
    %47 = vector.load %arg6[%c0_16, %c0_17, %c0_18] : memref<1x16x64xbf16, #tpu.memory_space<vmem>>, vector<1x16x64xbf16>
    tpu.vector_store %arg6[%c0_16, %c0_17, %c0_18], %46 {strides = array<i32>} : memref<1x16x64xbf16, #tpu.memory_space<vmem>>, vector<1x16x64xbf16>,
    %48 = vector.shape_cast %19 : vector<6x64xf32> to vector<1x6x64xf32>
    %c0_19 = arith.constant 0 : index
    %c0_20 = arith.constant 0 : index
    %c0_21 = arith.constant 0 : index
    %49 = vector.load %arg7[%c0_19, %c0_20, %c0_21] : memref<1x6x64xf32, #tpu.memory_space<vmem>>, vector<1x6x64xf32>
    tpu.vector_store %arg7[%c0_19, %c0_20, %c0_21], %48 {strides = array<i32>} : memref<1x6x64xf32, #tpu.memory_space<vmem>>, vector<1x6x64xf32>,
    %c0_22 = arith.constant 0 : index
    %c0_23 = arith.constant 0 : index
    %c0_24 = arith.constant 0 : index
    %50 = vector.load %arg4[%c0_22, %c0_23, %c0_24] : memref<1x64x64xi8, #tpu.memory_space<vmem>>, vector<1x64x64xi8>
    %51 = vector.shape_cast %50 : vector<1x64x64xi8> to vector<64x64xi8>
    %52 = arith.sitofp %51 : vector<64x64xi8> to vector<64x64xf32>
    %53 = arith.mulf %29, %52 : vector<64x64xf32>
    %cst_25 = arith.constant dense<0.000000e+00> : vector<64xf32>
    %54 = vector.multi_reduction <add>, %53, %cst_25 [0] : vector<64x64xf32> to vector<64xf32>
    %55 = vector.shape_cast %54 : vector<64xf32> to vector<1x64xf32>
    %56 = vector.shape_cast %55 : vector<1x64xf32> to vector<1x1x1x64xf32>
    %c0_26 = arith.constant 0 : index
    %c0_27 = arith.constant 0 : index
    %c0_28 = arith.constant 0 : index
    %c0_29 = arith.constant 0 : index
    %57 = vector.load %arg8[%c0_26, %c0_27, %c0_28, %c0_29] : memref<1x1x1x64xf32, #tpu.memory_space<vmem>>, vector<1x1x1x64xf32>
    tpu.vector_store %arg8[%c0_26, %c0_27, %c0_28, %c0_29], %56 {strides = array<i32>} : memref<1x1x1x64xf32, #tpu.memory_space<vmem>>, vector<1x1x1x64xf32>,
    %cst_30 = arith.constant dense<0.000000e+00> : vector<64xf32>
    %58 = vector.multi_reduction <add>, %52, %cst_30 [0] : vector<64x64xf32> to vector<64xf32>
    %59 = vector.shape_cast %58 : vector<64xf32> to vector<1x64xf32>
    %60 = vector.shape_cast %59 : vector<1x64xf32> to vector<1x1x1x64xf32>
    %c0_31 = arith.constant 0 : index
    %c0_32 = arith.constant 0 : index
    %c0_33 = arith.constant 0 : index
    %c0_34 = arith.constant 0 : index
    %61 = vector.load %arg9[%c0_31, %c0_32, %c0_33, %c0_34] : memref<1x1x1x64xf32, #tpu.memory_space<vmem>>, vector<1x1x1x64xf32>
    tpu.vector_store %arg9[%c0_31, %c0_32, %c0_33, %c0_34], %60 {strides = array<i32>} : memref<1x1x1x64xf32, #tpu.memory_space<vmem>>, vector<1x1x1x64xf32>,
    return
  }
  func.func @transform_0(%arg0: i32, %arg1: i32) -> (i32, i32, i32) {
    %c0_i32 = arith.constant 0 : i32
    %c0_i32_0 = arith.constant 0 : i32
    %c0_i32_1 = arith.constant 0 : i32
    return %arg0, %c0_i32, %c0_i32_0 : i32, i32, i32
  }
  func.func @transform_1(%arg0: i32, %arg1: i32) -> (i32, i32, i32) {
    %c0_i32 = arith.constant 0 : i32
    %c0_i32_0 = arith.constant 0 : i32
    return %arg0, %c0_i32, %arg1 : i32, i32, i32
  }
  func.func @transform_2(%arg0: i32, %arg1: i32) -> (i32, i32, i32) {
    %c0_i32 = arith.constant 0 : i32
    %c0_i32_0 = arith.constant 0 : i32
    return %arg0, %arg1, %c0_i32 : i32, i32, i32
  }
  func.func @transform_3(%arg0: i32, %arg1: i32) -> (i32, i32) {
    %c0_i32 = arith.constant 0 : i32
    %c0_i32_0 = arith.constant 0 : i32
    %c0_i32_1 = arith.constant 0 : i32
    return %c0_i32, %c0_i32_0 : i32, i32
  }
  func.func @transform_4(%arg0: i32, %arg1: i32) -> (i32, i32, i32) {
    %c0_i32 = arith.constant 0 : i32
    %c0_i32_0 = arith.constant 0 : i32
    return %arg0, %c0_i32, %arg1 : i32, i32, i32
  }
  func.func @transform_5(%arg0: i32, %arg1: i32) -> (i32, i32, i32) {
    %c0_i32 = arith.constant 0 : i32
    %c0_i32_0 = arith.constant 0 : i32
    return %arg0, %c0_i32, %arg1 : i32, i32, i32
  }
  func.func @transform_6(%arg0: i32, %arg1: i32) -> (i32, i32, i32, i32) {
    %c0_i32 = arith.constant 0 : i32
    %c0_i32_0 = arith.constant 0 : i32
    %c0_i32_1 = arith.constant 0 : i32
    return %arg0, %arg1, %c0_i32, %c0_i32_0 : i32, i32, i32, i32
  }
  func.func @transform_7(%arg0: i32, %arg1: i32) -> (i32, i32, i32, i32) {
    %c0_i32 = arith.constant 0 : i32
    %c0_i32_0 = arith.constant 0 : i32
    %c0_i32_1 = arith.constant 0 : i32
    return %arg0, %arg1, %c0_i32, %c0_i32_0 : i32, i32, i32, i32
  }
}

module attributes {stable_mosaic.version = 11 : i64} {
  func.func @_conv_pool_kernel(%arg0: i32, %arg1: i32, %arg2: memref<1x16x19x32xbf16, #tpu.memory_space<vmem>>, %arg3: memref<32x19xbf16, #tpu.memory_space<vmem>>, %arg4: memref<32x1xf32, #tpu.memory_space<vmem>>, %arg5: memref<1x32x32xf32, #tpu.memory_space<vmem>>) attributes {dimension_semantics = [#tpu.dimension_semantics<parallel>, #tpu.dimension_semantics<parallel>], iteration_bounds = array<i64: 2, 1>, scalar_prefetch = 0 : i64, scratch_operands = 0 : i64, tpu.core_type = #tpu.core_type<tc>, window_params = [{transform_indices = @transform_0, window_bounds = array<i64: 1, 16, 19, 32>}, {pipeline_mode = #tpu.pipeline_mode<synchronous>, transform_indices = @transform_1, window_bounds = array<i64: 32, 19>}, {pipeline_mode = #tpu.pipeline_mode<synchronous>, transform_indices = @transform_2, window_bounds = array<i64: 32, 1>}, {transform_indices = @transform_3, window_bounds = array<i64: 1, 32, 32>}]} {
    %c0 = arith.constant 0 : index
    %c0_0 = arith.constant 0 : index
    %0 = vector.load %arg3[%c0, %c0_0] : memref<32x19xbf16, #tpu.memory_space<vmem>>, vector<32x19xbf16>
    %c0_1 = arith.constant 0 : index
    %c0_2 = arith.constant 0 : index
    %1 = vector.load %arg4[%c0_1, %c0_2] : memref<32x1xf32, #tpu.memory_space<vmem>>, vector<32x1xf32>
    %cst = arith.constant 0.000000e+00 : f32
    %2 = vector.broadcast %cst : f32 to vector<32x32xf32>
    %c0_i32 = arith.constant 0 : i32
    %c0_3 = arith.constant 0 : index
    %3 = arith.index_cast %c0_i32 : i32 to index
    %c0_4 = arith.constant 0 : index
    %c0_5 = arith.constant 0 : index
    %4 = vector.load %arg2[%c0_3, %3, %c0_4, %c0_5] : memref<1x16x19x32xbf16, #tpu.memory_space<vmem>>, vector<1x1x19x32xbf16>
    %5 = vector.shape_cast %4 : vector<1x1x19x32xbf16> to vector<19x32xbf16>
    %cst_6 = arith.constant dense<0.000000e+00> : vector<32x32xf32>
    %6 = tpu.matmul %0, %5, %cst_6 {dimension_numbers = #tpu.dot_dimension_numbers<[1], [0], [0], [1], [0, 0, 1, 1], [], []>} : vector<32x19xbf16>, vector<19x32xbf16>, vector<32x32xf32> -> vector<32x32xf32>
    %7 = vector.broadcast %1 : vector<32x1xf32> to vector<32x32xf32>
    %8 = arith.addf %6, %7 : vector<32x32xf32>
    %cst_7 = arith.constant 0.000000e+00 : f32
    %9 = vector.broadcast %cst_7 : f32 to vector<32x32xf32>
    %10 = arith.maximumf %8, %9 : vector<32x32xf32>
    %11 = arith.maximumf %2, %10 : vector<32x32xf32>
    %c1_i32 = arith.constant 1 : i32
    %c0_8 = arith.constant 0 : index
    %12 = arith.index_cast %c1_i32 : i32 to index
    %c0_9 = arith.constant 0 : index
    %c0_10 = arith.constant 0 : index
    %13 = vector.load %arg2[%c0_8, %12, %c0_9, %c0_10] : memref<1x16x19x32xbf16, #tpu.memory_space<vmem>>, vector<1x1x19x32xbf16>
    %14 = vector.shape_cast %13 : vector<1x1x19x32xbf16> to vector<19x32xbf16>
    %cst_11 = arith.constant dense<0.000000e+00> : vector<32x32xf32>
    %15 = tpu.matmul %0, %14, %cst_11 {dimension_numbers = #tpu.dot_dimension_numbers<[1], [0], [0], [1], [0, 0, 1, 1], [], []>} : vector<32x19xbf16>, vector<19x32xbf16>, vector<32x32xf32> -> vector<32x32xf32>
    %16 = vector.broadcast %1 : vector<32x1xf32> to vector<32x32xf32>
    %17 = arith.addf %15, %16 : vector<32x32xf32>
    %cst_12 = arith.constant 0.000000e+00 : f32
    %18 = vector.broadcast %cst_12 : f32 to vector<32x32xf32>
    %19 = arith.maximumf %17, %18 : vector<32x32xf32>
    %20 = arith.maximumf %11, %19 : vector<32x32xf32>
    %c2_i32 = arith.constant 2 : i32
    %c0_13 = arith.constant 0 : index
    %21 = arith.index_cast %c2_i32 : i32 to index
    %c0_14 = arith.constant 0 : index
    %c0_15 = arith.constant 0 : index
    %22 = vector.load %arg2[%c0_13, %21, %c0_14, %c0_15] : memref<1x16x19x32xbf16, #tpu.memory_space<vmem>>, vector<1x1x19x32xbf16>
    %23 = vector.shape_cast %22 : vector<1x1x19x32xbf16> to vector<19x32xbf16>
    %cst_16 = arith.constant dense<0.000000e+00> : vector<32x32xf32>
    %24 = tpu.matmul %0, %23, %cst_16 {dimension_numbers = #tpu.dot_dimension_numbers<[1], [0], [0], [1], [0, 0, 1, 1], [], []>} : vector<32x19xbf16>, vector<19x32xbf16>, vector<32x32xf32> -> vector<32x32xf32>
    %25 = vector.broadcast %1 : vector<32x1xf32> to vector<32x32xf32>
    %26 = arith.addf %24, %25 : vector<32x32xf32>
    %cst_17 = arith.constant 0.000000e+00 : f32
    %27 = vector.broadcast %cst_17 : f32 to vector<32x32xf32>
    %28 = arith.maximumf %26, %27 : vector<32x32xf32>
    %29 = arith.maximumf %20, %28 : vector<32x32xf32>
    %c3_i32 = arith.constant 3 : i32
    %c0_18 = arith.constant 0 : index
    %30 = arith.index_cast %c3_i32 : i32 to index
    %c0_19 = arith.constant 0 : index
    %c0_20 = arith.constant 0 : index
    %31 = vector.load %arg2[%c0_18, %30, %c0_19, %c0_20] : memref<1x16x19x32xbf16, #tpu.memory_space<vmem>>, vector<1x1x19x32xbf16>
    %32 = vector.shape_cast %31 : vector<1x1x19x32xbf16> to vector<19x32xbf16>
    %cst_21 = arith.constant dense<0.000000e+00> : vector<32x32xf32>
    %33 = tpu.matmul %0, %32, %cst_21 {dimension_numbers = #tpu.dot_dimension_numbers<[1], [0], [0], [1], [0, 0, 1, 1], [], []>} : vector<32x19xbf16>, vector<19x32xbf16>, vector<32x32xf32> -> vector<32x32xf32>
    %34 = vector.broadcast %1 : vector<32x1xf32> to vector<32x32xf32>
    %35 = arith.addf %33, %34 : vector<32x32xf32>
    %cst_22 = arith.constant 0.000000e+00 : f32
    %36 = vector.broadcast %cst_22 : f32 to vector<32x32xf32>
    %37 = arith.maximumf %35, %36 : vector<32x32xf32>
    %38 = arith.maximumf %29, %37 : vector<32x32xf32>
    %c4_i32 = arith.constant 4 : i32
    %c0_23 = arith.constant 0 : index
    %39 = arith.index_cast %c4_i32 : i32 to index
    %c0_24 = arith.constant 0 : index
    %c0_25 = arith.constant 0 : index
    %40 = vector.load %arg2[%c0_23, %39, %c0_24, %c0_25] : memref<1x16x19x32xbf16, #tpu.memory_space<vmem>>, vector<1x1x19x32xbf16>
    %41 = vector.shape_cast %40 : vector<1x1x19x32xbf16> to vector<19x32xbf16>
    %cst_26 = arith.constant dense<0.000000e+00> : vector<32x32xf32>
    %42 = tpu.matmul %0, %41, %cst_26 {dimension_numbers = #tpu.dot_dimension_numbers<[1], [0], [0], [1], [0, 0, 1, 1], [], []>} : vector<32x19xbf16>, vector<19x32xbf16>, vector<32x32xf32> -> vector<32x32xf32>
    %43 = vector.broadcast %1 : vector<32x1xf32> to vector<32x32xf32>
    %44 = arith.addf %42, %43 : vector<32x32xf32>
    %cst_27 = arith.constant 0.000000e+00 : f32
    %45 = vector.broadcast %cst_27 : f32 to vector<32x32xf32>
    %46 = arith.maximumf %44, %45 : vector<32x32xf32>
    %47 = arith.maximumf %38, %46 : vector<32x32xf32>
    %c5_i32 = arith.constant 5 : i32
    %c0_28 = arith.constant 0 : index
    %48 = arith.index_cast %c5_i32 : i32 to index
    %c0_29 = arith.constant 0 : index
    %c0_30 = arith.constant 0 : index
    %49 = vector.load %arg2[%c0_28, %48, %c0_29, %c0_30] : memref<1x16x19x32xbf16, #tpu.memory_space<vmem>>, vector<1x1x19x32xbf16>
    %50 = vector.shape_cast %49 : vector<1x1x19x32xbf16> to vector<19x32xbf16>
    %cst_31 = arith.constant dense<0.000000e+00> : vector<32x32xf32>
    %51 = tpu.matmul %0, %50, %cst_31 {dimension_numbers = #tpu.dot_dimension_numbers<[1], [0], [0], [1], [0, 0, 1, 1], [], []>} : vector<32x19xbf16>, vector<19x32xbf16>, vector<32x32xf32> -> vector<32x32xf32>
    %52 = vector.broadcast %1 : vector<32x1xf32> to vector<32x32xf32>
    %53 = arith.addf %51, %52 : vector<32x32xf32>
    %cst_32 = arith.constant 0.000000e+00 : f32
    %54 = vector.broadcast %cst_32 : f32 to vector<32x32xf32>
    %55 = arith.maximumf %53, %54 : vector<32x32xf32>
    %56 = arith.maximumf %47, %55 : vector<32x32xf32>
    %c6_i32 = arith.constant 6 : i32
    %c0_33 = arith.constant 0 : index
    %57 = arith.index_cast %c6_i32 : i32 to index
    %c0_34 = arith.constant 0 : index
    %c0_35 = arith.constant 0 : index
    %58 = vector.load %arg2[%c0_33, %57, %c0_34, %c0_35] : memref<1x16x19x32xbf16, #tpu.memory_space<vmem>>, vector<1x1x19x32xbf16>
    %59 = vector.shape_cast %58 : vector<1x1x19x32xbf16> to vector<19x32xbf16>
    %cst_36 = arith.constant dense<0.000000e+00> : vector<32x32xf32>
    %60 = tpu.matmul %0, %59, %cst_36 {dimension_numbers = #tpu.dot_dimension_numbers<[1], [0], [0], [1], [0, 0, 1, 1], [], []>} : vector<32x19xbf16>, vector<19x32xbf16>, vector<32x32xf32> -> vector<32x32xf32>
    %61 = vector.broadcast %1 : vector<32x1xf32> to vector<32x32xf32>
    %62 = arith.addf %60, %61 : vector<32x32xf32>
    %cst_37 = arith.constant 0.000000e+00 : f32
    %63 = vector.broadcast %cst_37 : f32 to vector<32x32xf32>
    %64 = arith.maximumf %62, %63 : vector<32x32xf32>
    %65 = arith.maximumf %56, %64 : vector<32x32xf32>
    %c7_i32 = arith.constant 7 : i32
    %c0_38 = arith.constant 0 : index
    %66 = arith.index_cast %c7_i32 : i32 to index
    %c0_39 = arith.constant 0 : index
    %c0_40 = arith.constant 0 : index
    %67 = vector.load %arg2[%c0_38, %66, %c0_39, %c0_40] : memref<1x16x19x32xbf16, #tpu.memory_space<vmem>>, vector<1x1x19x32xbf16>
    %68 = vector.shape_cast %67 : vector<1x1x19x32xbf16> to vector<19x32xbf16>
    %cst_41 = arith.constant dense<0.000000e+00> : vector<32x32xf32>
    %69 = tpu.matmul %0, %68, %cst_41 {dimension_numbers = #tpu.dot_dimension_numbers<[1], [0], [0], [1], [0, 0, 1, 1], [], []>} : vector<32x19xbf16>, vector<19x32xbf16>, vector<32x32xf32> -> vector<32x32xf32>
    %70 = vector.broadcast %1 : vector<32x1xf32> to vector<32x32xf32>
    %71 = arith.addf %69, %70 : vector<32x32xf32>
    %cst_42 = arith.constant 0.000000e+00 : f32
    %72 = vector.broadcast %cst_42 : f32 to vector<32x32xf32>
    %73 = arith.maximumf %71, %72 : vector<32x32xf32>
    %74 = arith.maximumf %65, %73 : vector<32x32xf32>
    %c8_i32 = arith.constant 8 : i32
    %c0_43 = arith.constant 0 : index
    %75 = arith.index_cast %c8_i32 : i32 to index
    %c0_44 = arith.constant 0 : index
    %c0_45 = arith.constant 0 : index
    %76 = vector.load %arg2[%c0_43, %75, %c0_44, %c0_45] : memref<1x16x19x32xbf16, #tpu.memory_space<vmem>>, vector<1x1x19x32xbf16>
    %77 = vector.shape_cast %76 : vector<1x1x19x32xbf16> to vector<19x32xbf16>
    %cst_46 = arith.constant dense<0.000000e+00> : vector<32x32xf32>
    %78 = tpu.matmul %0, %77, %cst_46 {dimension_numbers = #tpu.dot_dimension_numbers<[1], [0], [0], [1], [0, 0, 1, 1], [], []>} : vector<32x19xbf16>, vector<19x32xbf16>, vector<32x32xf32> -> vector<32x32xf32>
    %79 = vector.broadcast %1 : vector<32x1xf32> to vector<32x32xf32>
    %80 = arith.addf %78, %79 : vector<32x32xf32>
    %cst_47 = arith.constant 0.000000e+00 : f32
    %81 = vector.broadcast %cst_47 : f32 to vector<32x32xf32>
    %82 = arith.maximumf %80, %81 : vector<32x32xf32>
    %83 = arith.maximumf %74, %82 : vector<32x32xf32>
    %c9_i32 = arith.constant 9 : i32
    %c0_48 = arith.constant 0 : index
    %84 = arith.index_cast %c9_i32 : i32 to index
    %c0_49 = arith.constant 0 : index
    %c0_50 = arith.constant 0 : index
    %85 = vector.load %arg2[%c0_48, %84, %c0_49, %c0_50] : memref<1x16x19x32xbf16, #tpu.memory_space<vmem>>, vector<1x1x19x32xbf16>
    %86 = vector.shape_cast %85 : vector<1x1x19x32xbf16> to vector<19x32xbf16>
    %cst_51 = arith.constant dense<0.000000e+00> : vector<32x32xf32>
    %87 = tpu.matmul %0, %86, %cst_51 {dimension_numbers = #tpu.dot_dimension_numbers<[1], [0], [0], [1], [0, 0, 1, 1], [], []>} : vector<32x19xbf16>, vector<19x32xbf16>, vector<32x32xf32> -> vector<32x32xf32>
    %88 = vector.broadcast %1 : vector<32x1xf32> to vector<32x32xf32>
    %89 = arith.addf %87, %88 : vector<32x32xf32>
    %cst_52 = arith.constant 0.000000e+00 : f32
    %90 = vector.broadcast %cst_52 : f32 to vector<32x32xf32>
    %91 = arith.maximumf %89, %90 : vector<32x32xf32>
    %92 = arith.maximumf %83, %91 : vector<32x32xf32>
    %c10_i32 = arith.constant 10 : i32
    %c0_53 = arith.constant 0 : index
    %93 = arith.index_cast %c10_i32 : i32 to index
    %c0_54 = arith.constant 0 : index
    %c0_55 = arith.constant 0 : index
    %94 = vector.load %arg2[%c0_53, %93, %c0_54, %c0_55] : memref<1x16x19x32xbf16, #tpu.memory_space<vmem>>, vector<1x1x19x32xbf16>
    %95 = vector.shape_cast %94 : vector<1x1x19x32xbf16> to vector<19x32xbf16>
    %cst_56 = arith.constant dense<0.000000e+00> : vector<32x32xf32>
    %96 = tpu.matmul %0, %95, %cst_56 {dimension_numbers = #tpu.dot_dimension_numbers<[1], [0], [0], [1], [0, 0, 1, 1], [], []>} : vector<32x19xbf16>, vector<19x32xbf16>, vector<32x32xf32> -> vector<32x32xf32>
    %97 = vector.broadcast %1 : vector<32x1xf32> to vector<32x32xf32>
    %98 = arith.addf %96, %97 : vector<32x32xf32>
    %cst_57 = arith.constant 0.000000e+00 : f32
    %99 = vector.broadcast %cst_57 : f32 to vector<32x32xf32>
    %100 = arith.maximumf %98, %99 : vector<32x32xf32>
    %101 = arith.maximumf %92, %100 : vector<32x32xf32>
    %c11_i32 = arith.constant 11 : i32
    %c0_58 = arith.constant 0 : index
    %102 = arith.index_cast %c11_i32 : i32 to index
    %c0_59 = arith.constant 0 : index
    %c0_60 = arith.constant 0 : index
    %103 = vector.load %arg2[%c0_58, %102, %c0_59, %c0_60] : memref<1x16x19x32xbf16, #tpu.memory_space<vmem>>, vector<1x1x19x32xbf16>
    %104 = vector.shape_cast %103 : vector<1x1x19x32xbf16> to vector<19x32xbf16>
    %cst_61 = arith.constant dense<0.000000e+00> : vector<32x32xf32>
    %105 = tpu.matmul %0, %104, %cst_61 {dimension_numbers = #tpu.dot_dimension_numbers<[1], [0], [0], [1], [0, 0, 1, 1], [], []>} : vector<32x19xbf16>, vector<19x32xbf16>, vector<32x32xf32> -> vector<32x32xf32>
    %106 = vector.broadcast %1 : vector<32x1xf32> to vector<32x32xf32>
    %107 = arith.addf %105, %106 : vector<32x32xf32>
    %cst_62 = arith.constant 0.000000e+00 : f32
    %108 = vector.broadcast %cst_62 : f32 to vector<32x32xf32>
    %109 = arith.maximumf %107, %108 : vector<32x32xf32>
    %110 = arith.maximumf %101, %109 : vector<32x32xf32>
    %c12_i32 = arith.constant 12 : i32
    %c0_63 = arith.constant 0 : index
    %111 = arith.index_cast %c12_i32 : i32 to index
    %c0_64 = arith.constant 0 : index
    %c0_65 = arith.constant 0 : index
    %112 = vector.load %arg2[%c0_63, %111, %c0_64, %c0_65] : memref<1x16x19x32xbf16, #tpu.memory_space<vmem>>, vector<1x1x19x32xbf16>
    %113 = vector.shape_cast %112 : vector<1x1x19x32xbf16> to vector<19x32xbf16>
    %cst_66 = arith.constant dense<0.000000e+00> : vector<32x32xf32>
    %114 = tpu.matmul %0, %113, %cst_66 {dimension_numbers = #tpu.dot_dimension_numbers<[1], [0], [0], [1], [0, 0, 1, 1], [], []>} : vector<32x19xbf16>, vector<19x32xbf16>, vector<32x32xf32> -> vector<32x32xf32>
    %115 = vector.broadcast %1 : vector<32x1xf32> to vector<32x32xf32>
    %116 = arith.addf %114, %115 : vector<32x32xf32>
    %cst_67 = arith.constant 0.000000e+00 : f32
    %117 = vector.broadcast %cst_67 : f32 to vector<32x32xf32>
    %118 = arith.maximumf %116, %117 : vector<32x32xf32>
    %119 = arith.maximumf %110, %118 : vector<32x32xf32>
    %c13_i32 = arith.constant 13 : i32
    %c0_68 = arith.constant 0 : index
    %120 = arith.index_cast %c13_i32 : i32 to index
    %c0_69 = arith.constant 0 : index
    %c0_70 = arith.constant 0 : index
    %121 = vector.load %arg2[%c0_68, %120, %c0_69, %c0_70] : memref<1x16x19x32xbf16, #tpu.memory_space<vmem>>, vector<1x1x19x32xbf16>
    %122 = vector.shape_cast %121 : vector<1x1x19x32xbf16> to vector<19x32xbf16>
    %cst_71 = arith.constant dense<0.000000e+00> : vector<32x32xf32>
    %123 = tpu.matmul %0, %122, %cst_71 {dimension_numbers = #tpu.dot_dimension_numbers<[1], [0], [0], [1], [0, 0, 1, 1], [], []>} : vector<32x19xbf16>, vector<19x32xbf16>, vector<32x32xf32> -> vector<32x32xf32>
    %124 = vector.broadcast %1 : vector<32x1xf32> to vector<32x32xf32>
    %125 = arith.addf %123, %124 : vector<32x32xf32>
    %cst_72 = arith.constant 0.000000e+00 : f32
    %126 = vector.broadcast %cst_72 : f32 to vector<32x32xf32>
    %127 = arith.maximumf %125, %126 : vector<32x32xf32>
    %128 = arith.maximumf %119, %127 : vector<32x32xf32>
    %c14_i32 = arith.constant 14 : i32
    %c0_73 = arith.constant 0 : index
    %129 = arith.index_cast %c14_i32 : i32 to index
    %c0_74 = arith.constant 0 : index
    %c0_75 = arith.constant 0 : index
    %130 = vector.load %arg2[%c0_73, %129, %c0_74, %c0_75] : memref<1x16x19x32xbf16, #tpu.memory_space<vmem>>, vector<1x1x19x32xbf16>
    %131 = vector.shape_cast %130 : vector<1x1x19x32xbf16> to vector<19x32xbf16>
    %cst_76 = arith.constant dense<0.000000e+00> : vector<32x32xf32>
    %132 = tpu.matmul %0, %131, %cst_76 {dimension_numbers = #tpu.dot_dimension_numbers<[1], [0], [0], [1], [0, 0, 1, 1], [], []>} : vector<32x19xbf16>, vector<19x32xbf16>, vector<32x32xf32> -> vector<32x32xf32>
    %133 = vector.broadcast %1 : vector<32x1xf32> to vector<32x32xf32>
    %134 = arith.addf %132, %133 : vector<32x32xf32>
    %cst_77 = arith.constant 0.000000e+00 : f32
    %135 = vector.broadcast %cst_77 : f32 to vector<32x32xf32>
    %136 = arith.maximumf %134, %135 : vector<32x32xf32>
    %137 = arith.maximumf %128, %136 : vector<32x32xf32>
    %c15_i32 = arith.constant 15 : i32
    %c0_78 = arith.constant 0 : index
    %138 = arith.index_cast %c15_i32 : i32 to index
    %c0_79 = arith.constant 0 : index
    %c0_80 = arith.constant 0 : index
    %139 = vector.load %arg2[%c0_78, %138, %c0_79, %c0_80] : memref<1x16x19x32xbf16, #tpu.memory_space<vmem>>, vector<1x1x19x32xbf16>
    %140 = vector.shape_cast %139 : vector<1x1x19x32xbf16> to vector<19x32xbf16>
    %cst_81 = arith.constant dense<0.000000e+00> : vector<32x32xf32>
    %141 = tpu.matmul %0, %140, %cst_81 {dimension_numbers = #tpu.dot_dimension_numbers<[1], [0], [0], [1], [0, 0, 1, 1], [], []>} : vector<32x19xbf16>, vector<19x32xbf16>, vector<32x32xf32> -> vector<32x32xf32>
    %142 = vector.broadcast %1 : vector<32x1xf32> to vector<32x32xf32>
    %143 = arith.addf %141, %142 : vector<32x32xf32>
    %cst_82 = arith.constant 0.000000e+00 : f32
    %144 = vector.broadcast %cst_82 : f32 to vector<32x32xf32>
    %145 = arith.maximumf %143, %144 : vector<32x32xf32>
    %146 = arith.maximumf %137, %145 : vector<32x32xf32>
    %c16_i32 = arith.constant 16 : i32
    %147 = vector.shape_cast %146 : vector<32x32xf32> to vector<1x32x32xf32>
    %c0_83 = arith.constant 0 : index
    %c0_84 = arith.constant 0 : index
    %c0_85 = arith.constant 0 : index
    %148 = vector.load %arg5[%c0_83, %c0_84, %c0_85] : memref<1x32x32xf32, #tpu.memory_space<vmem>>, vector<1x32x32xf32>
    tpu.vector_store %arg5[%c0_83, %c0_84, %c0_85], %147 {strides = array<i32>} : memref<1x32x32xf32, #tpu.memory_space<vmem>>, vector<1x32x32xf32>,
    return
  }
  func.func @transform_0(%arg0: i32, %arg1: i32) -> (i32, i32, i32, i32) {
    %c0_i32 = arith.constant 0 : i32
    %c0_i32_0 = arith.constant 0 : i32
    %c0_i32_1 = arith.constant 0 : i32
    return %arg0, %c0_i32, %c0_i32_0, %arg1 : i32, i32, i32, i32
  }
  func.func @transform_1(%arg0: i32, %arg1: i32) -> (i32, i32) {
    %c0_i32 = arith.constant 0 : i32
    %c0_i32_0 = arith.constant 0 : i32
    %c0_i32_1 = arith.constant 0 : i32
    return %c0_i32, %c0_i32_0 : i32, i32
  }
  func.func @transform_2(%arg0: i32, %arg1: i32) -> (i32, i32) {
    %c0_i32 = arith.constant 0 : i32
    %c0_i32_0 = arith.constant 0 : i32
    %c0_i32_1 = arith.constant 0 : i32
    return %c0_i32, %c0_i32_0 : i32, i32
  }
  func.func @transform_3(%arg0: i32, %arg1: i32) -> (i32, i32, i32) {
    %c0_i32 = arith.constant 0 : i32
    %c0_i32_0 = arith.constant 0 : i32
    return %arg0, %c0_i32, %arg1 : i32, i32, i32
  }
}

</mosaic_0001>

<bundles_post_ra>
// kernel: set_abstraction_forward.2
= control target key start
LH: loop header
LB: loop body
LE: loop exit
PB: predicated region body
PF: predicated region fallthrough
CT: control target
= control target key end

     0   :  { %s1487_s24 = smov 0   ;;  %s1489_s25 = smov 0   ;;  %s1687_s0 = inlined_call_operand.vmem [shape: bf16[2,16,72], index: 0, kind: input, shape index: {}]   ;;  %s1688_s1 = inlined_call_operand.vmem [shape: bf16[2,16,64], index: 1, kind: input, shape index: {}]   ;;  %s1689_s2 = inlined_call_operand.vmem [shape: s8[2,64,64], index: 2, kind: input, shape index: {}]   ;;  %s1690_s3 = inlined_call_operand.vmem [shape: bf16[48,16], index: 3, kind: input, shape index: {}]   ;;  %s1691_s4 = inlined_call_operand.vmem [shape: bf16[2,16,64], index: 4, kind: output, shape index: {0}]   ;;  %s1692_s5 = inlined_call_operand.vmem [shape: f32[2,6,64], index: 5, kind: output, shape index: {1}]   ;;  %s1693_s6 = inlined_call_operand.vmem [shape: f32[2,1,1,64], index: 6, kind: output, shape index: {2}]   ;;  %s1694_s7 = inlined_call_operand.vmem [shape: f32[2,1,1,64], index: 7, kind: output, shape index: {3}]  }
   0x1   :  { %s1491_s26 = smov 0  }
   0x2 LB: > { %s30_s27 = sadd.s32 1, %s1438_s25  ;;  %p1247_p0 = scmp.ge.s32.totalorder %s1442_s26, 1  ;;  %s1442_s26 = sphi %s1491_s26, %s18_s26   ;;  %s1438_s25 = sphi %s1489_s25, %s1696_s25   ;;  %s1434_s24 = sphi %s1487_s24, %s1695_s24  }
   0x3   : > { %p32_p1 = scmp.ge.s32.totalorder %s30_s27, 2  ;;  %p296_p2 = scmp.lt.s32.totalorder %s1442_s26, 3 }
   0x5   : > { %s1698_s27 = smov (%p32_p1, %s30_s27), 0  ;;  %p297_p3 = pnand %p1247_p0, %p296_p2 }
   0x6   : > { %p367_p4 = scmp.lt.s32.totalorder (!%p297_p3), %s1434_s24, 1  ;;  %v1444_v0 = vmov (!%p297_p3), 0.0   ;;  %vm1445_vm0 = vmmov (!%p297_p3), 0   ;;  %v1380_v1 = vld [vmem:[%s1690_s3] sm:$0xff] (!%p297_p3)   ;;  %vm439_vm1 = vcmask (!%p297_p3), 130048   ;;  %v1382_v4 = vld [vmem:[%s1690_s3 + $0x8] sm:$0xff] (!%p297_p3)  }
   0x7   : > { %300 = sbr.rel (%p297_p3) target bundleno = 1131 (0x46b), region = 36  ;;  %1301 = vmatprep.subr.bf16.mxu0 (!%p297_p3), %v1444_v0  ;;  %1303 = vmatprep.mubr.msk.bf16.mxu0 (!%p297_p3), %vm1445_vm0, %v1444_v0  ;;  %v1383_v5 = vld [vmem:[%s1690_s3 + $0x10] sm:$0xff] (!%p297_p3)   ;;  %s1446_s18 = smov (!%p297_p3), 64   ;;  %vm714_vm2 = vcmask (!%p297_p3), 523264   ;;  %vm803_vm3 = vcmask (!%p297_p3), 521216   ;;  %vm835_vm4 = vcmask (!%p297_p3), 1042432  }
   0x8   : > { %1329 = vmatprep.subr.bf16.mxu1 (!%p297_p3), %v1444_v0  ;;  %1331 = vmatprep.mubr.msk.bf16.mxu1 (!%p297_p3), %vm1445_vm0, %v1444_v0  ;;  %vm995_vm5 = vcmask (!%p297_p3), 516096   ;;  %vm831_vm6 = vcmask (!%p297_p3), 48128   ;;  %vm944_vm7 = vcmask (!%p297_p3), 519168  }
   0xe   : > { %s1700_s24 = smov (!%p367_p4, %s1434_s24), 1 }
   0xf   : > { %s1514_s28 = sshll.u32 %s1700_s24, 3  ;;  %s1278_s22 = sshll.u32 %s1700_s24, 4 }
  0x10   : > { %s379_s8 = scalar_lea.vmem %s1688_s1, %s1514_s28  ;;  %s371_s13 = scalar_lea.vmem %s1687_s0, %s1514_s28 }
  0x11   : > { %v1379_v2 = vld [vmem:[%s379_s8] sm:$0xff]   ;;  %s404_s21 = scalar_lea.vmem %s1692_s5, %s1514_s28  ;;  %s388_s30 = scalar_lea.vmem %s1689_s2, %s1278_s22 }
  0x12   : > { %v1381_v3 = vld [vmem:[%s371_s13] sm:$0xff]   ;;  %1302 = vmatpush3.bf16.msra.mxu0 %v1379_v2  ;;  %s416_s10 = scalar_lea.vmem %s1694_s7, %s1700_s24  ;;  %s410_s13 = scalar_lea.vmem %s1693_s6, %s1700_s24 }
  0x13   : > { %1307 = vmatprep.subr.bf16.mxu0 %v1381_v3  ;;  %s397_s16 = scalar_lea.vmem %s1691_s4, %s1514_s28 }
  0x15   : > { %1304 = vmatmul.mubr.msk.bf16.vlgmr.msra.gmra.mrb[0].mxu0 %vm439_vm1, %v1380_v1 }
  0x16   : > { %1308 = vmatpush3.bf16.msra.mxu0 %v1381_v3  ;;  %1309 = vmatprep.mubr.msk.bf16.mxu0 %vm439_vm1, %v1382_v4 }
  0x1d   : > { %1310 = vmatmul.mubr.msk.bf16.vlgmr.msra.gmra.mrb[4].mxu0 %vm439_vm1, %v1383_v5 }
  0xe8   : > { %v477_v6 = vpop.f32.mrb[0].mxu0 }
  0xe9   : > { %v1305_v7 = vpop.f32.mrb[1].mxu0 }
  0xea   : > { %v480_v8 = vpop.f32.mrb[2].mxu0 }
  0xeb   : > { %v484_v9 = vpack.c.bf16 %v480_v8, %v477_v6  ;;  %v1306_v10 = vpop.f32.mrb[3].mxu0 }
  0xed   : > { %558 = vxpose.xlu0.c.b16.start.end [1/1] (short) (narrow) %v484_v9, 64 }
  0xf0   : > { %v1311_v11 = vpop.f32.mrb[4].mxu0 }
  0xf1   : > { %v541_v12 = vpop.f32.mrb[5].mxu0 }
  0xf2   : > { %v1312_v13 = vpop.f32.mrb[6].mxu0 }
  0xf3   : > { %v1536_v14 = vpack.c.bf16 %v1312_v13, %v1311_v11  ;;  %v544_v15 = vpop.f32.mrb[7].mxu0 }
  0xf4   : > { %v556_v16 = vpack.c.bf16 %v544_v15, %v541_v12 }
  0xf6   : > { %1313 = vmatprep.subr.bf16.mxu0 %v556_v16 }
  0xf7   : > { %1314 = vmatpush3.bf16.msra.mxu0 %v556_v16 }
  0xf8   : > { %1323 = vmatprep.subr.bf16.mxu0 %v1444_v0 }
 0x102   : > { %652 = vrot.lane.b32.xlu0 %v556_v16, %s1446_s18 }
 0x153   : > { %v566_v17 = vpop.trf.xlu0 }
 0x154   : > { %1315 = vmatprep.mubr.msk.bf16.mxu0 %vm439_vm1, %v566_v17 }
 0x157   : > { %v567_v18 = vpop.trf.xlu0 }
 0x158   : > { %1316 = vmatmul.mubr.msk.bf16.vlgmr.msra.gmra.mrb[8].mxu0 %vm439_vm1, %v567_v18 }
 0x159   : > { %1324 = vmatpush3.bf16.msra.mxu0 %v484_v9 }
 0x15b   : > { %v568_v19 = vpop.trf.xlu0 }
 0x15c   : > { %1319 = vmatprep.mubr.msk.bf16.mxu0 %vm439_vm1, %v568_v19 }
 0x15f   : > { %v569_v20 = vpop.trf.xlu0 }
 0x160   : > { %1320 = vmatmul.mubr.msk.bf16.gmra.mrb[12].mxu0 %vm439_vm1, %v569_v20 }
 0x161   : > { %1325 = vmatprep.mubr.msk.bf16.mxu0 %vm1445_vm0, %v1444_v0 }
 0x174   : > { %v653_v21 = vpop.permute.xlu0 %652 }
 0x175   : > { %655 = vxpose.xlu1.c.b16.start.end [1/1] (short) (narrow) %v653_v21, 16 }
 0x1db   : > { %v663_v22 = vpop.trf.xlu1 }
 0x1dc   : > { %1326 = vmatmul.mubr.msk.bf16.vlgmr.msra.gmra.mrb[16].mxu0 %vm439_vm1, %v663_v22 }
 0x22b   : > { %v1317_v23 = vpop.f32.mrb[8].mxu0 }
 0x22c   : > { %v620_v24 = vpop.f32.mrb[9].mxu0  ;;  %v721_v32 = vsel %vm714_vm2, %v1317_v23, -inf }
 0x22d   : > { %v1318_v25 = vpop.f32.mrb[10].mxu0  ;;  %v715_v26 = vsel %vm714_vm2, %v620_v24, -inf }
 0x22e   : > { %716 = vmax.xlane.f32.xlu1 %v715_v26  ;;  %v623_v27 = vpop.f32.mrb[11].mxu0  ;;  %v724_v28 = vsel %vm714_vm2, %v1318_v25, -inf }
 0x22f   : > { %725 = vmax.xlane.f32.xlu0 %v724_v28  ;;  %v718_v29 = vsel %vm714_vm2, %v623_v27, -inf }
 0x232   : > { %719 = vmax.xlane.f32.xlu1 %v718_v29 }
 0x233   : > { %v1550_v30 = vpop.f32.mrb[12].mxu0 }
 0x234   : > { %v636_v31 = vpop.f32.mrb[13].mxu0  ;;  %v733_v37 = vsel %vm714_vm2, %v1550_v30, -inf }
 0x235   : > { %v1553_v33 = vpop.f32.mrb[14].mxu0  ;;  %v727_v35 = vsel %vm714_vm2, %v636_v31, -inf }
 0x236   : > { %722 = vmax.xlane.f32.xlu1 %v721_v32  ;;  %v639_v34 = vpop.f32.mrb[15].mxu0  ;;  %v736_v38 = vsel %vm714_vm2, %v1553_v33, -inf }
 0x237   : > { %v730_v36 = vsel %vm714_vm2, %v639_v34, -inf }
 0x23a   : > { %728 = vmax.xlane.f32.xlu1 %v727_v35 }
 0x23e   : > { %731 = vmax.xlane.f32.xlu1 %v730_v36 }
 0x242   : > { %734 = vmax.xlane.f32.xlu1 %v733_v37 }
 0x246   : > { %737 = vmax.xlane.f32.xlu1 %v736_v38 }
 0x2af   : > { %v708_v39 = vpop.f32.mrb[16].mxu0 }
 0x2b0   : > { %v804_v40 = vsel %vm803_vm3, %v708_v39, -inf  ;;  %947 = vst.msk [vmem:[%s404_s21] sm:$0x3f] %vm803_vm3, %v708_v39  ;;  %v1327_v41 = vpop.f32.mrb[17].mxu0 }
 0x2b1   : > { %v805_v42 = vrot.slane %v804_v40, 4  ;;  %v711_v43 = vpop.f32.mrb[18].mxu0 }
 0x2b2   : > { %v1328_v44 = vpop.f32.mrb[19].mxu0 }
 0x2b3   : > { %v806_v45 = vmax.f32 %v804_v40, %v805_v42  ;;  %v948_v42 = vld [vmem:[%s388_s30] sm:$0xff] }
 0x2b4   : > { %v950_v43 = vunpack.c.0.s8 %v948_v42  ;;  %v951_v44 = vunpack.c.1.s8 %v948_v42 }
 0x2b5   : > { %v807_v46 = vrot.slane %v806_v45, 2 }
 0x2b7   : > { %v808_v47 = vmax.f32 %v806_v45, %v807_v46  ;;  %v958_v45 = vcvt.s32.f32 %v950_v43  ;;  %v959_v46 = vcvt.s32.f32 %v951_v44 }
 0x2b9   : > { %v809_v48 = vrot.slane %v808_v47, 1 }
 0x2bb   : > { %v717_v49 = vpop.xlane.xlu1 %716  ;;  %v810_v50 = vmax.f32 %v808_v47, %v809_v48  ;;  %v952_v47 = vunpack.c.2.s8 %v948_v42  ;;  %v997_v48 = vsel %vm714_vm2, %v958_v45, 0.0 }
 0x2bc   : > { %v739_v51 = vsub.f32 %v620_v24, %v717_v49  ;;  %v726_v54 = vpop.xlane.xlu0 %725  ;;  %v998_v49 = vsel %vm714_vm2, %v959_v46, 0.0 }
 0x2bd   : > { %v811_v52 = vsub.f32 %v708_v39, %v810_v50  ;;  %v742_v58 = vsub.f32 %v1318_v25, %v726_v54  ;;  %v953_v50 = vunpack.c.3.s8 %v948_v42 }
 0x2be   : > { %v747_v53 = vmul.f32 1.442695, %v739_v51  ;;  %v960_v51 = vcvt.s32.f32 %v952_v47 }
 0x2bf   : > { %v720_v55 = vpop.xlane.xlu1 %719  ;;  %v812_v56 = vmul.f32 1.442695, %v811_v52  ;;  %v753_v62 = vmul.f32 1.442695, %v742_v58  ;;  %v999_v52 = vadd.f32 %v998_v49, %v997_v48 }
 0x2c0   : > { %1384 = vpow2.f32 %v747_v53  ;;  %v740_v57 = vsub.f32 %v623_v27, %v720_v55  ;;  %v949_v53 = vld [vmem:[%s388_s30 + $0x8] sm:$0xff]  ;;  %v1000_v54 = vsel %vm714_vm2, %v960_v51, 0.0  ;;  %v1612_v55 = vcvt.s32.f32 %v953_v50 }
 0x2c1   : > { %1386 = vpow2.f32 %v812_v56  ;;  %v954_v56 = vunpack.c.0.s8 %v949_v53 }
 0x2c2   : > { %v749_v59 = vmul.f32 1.442695, %v740_v57  ;;  %v1001_v57 = vadd.f32 %v1000_v54, %v999_v52  ;;  %v1002_v58 = vsel %vm714_vm2, %v1612_v55, 0.0 }
 0x2c3   : > { %v723_v60 = vpop.xlane.xlu1 %722 }
 0x2c4   : > { %1388 = vpow2.f32 %v749_v59  ;;  %v741_v61 = vsub.f32 %v1317_v23, %v723_v60  ;;  %v955_v59 = vunpack.c.1.s8 %v949_v53  ;;  %v1616_v60 = vcvt.s32.f32 %v954_v56 }
 0x2c6   : > { %v751_v63 = vmul.f32 1.442695, %v741_v61  ;;  %v1003_v61 = vadd.f32 %v1002_v58, %v1001_v57 }
 0x2c7   : > { %v729_v1 = vpop.xlane.xlu1 %728 }
 0x2c8   : > { %1390 = vpow2.f32 %v751_v63  ;;  %v743_v2 = vsub.f32 %v636_v31, %v729_v1  ;;  %v1620_v63 = vcvt.s32.f32 %v955_v59 }
 0x2c9   : > { %1392 = vpow2.f32 %v753_v62  ;;  %v1004_v62 = vsel %vm714_vm2, %v1616_v60, 0.0 }
 0x2ca   : > { %v1567_v3 = vpop.eup %1384  ;;  %v755_v4 = vmul.f32 1.442695, %v743_v2  ;;  %v1005_v1 = vadd.f32 %v1004_v62, %v1003_v61  ;;  %v1006_v2 = vsel %vm714_vm2, %v1620_v63, 0.0 }
 0x2cb   : > { %v732_v5 = vpop.xlane.xlu1 %731  ;;  %v763_v6 = vsel %vm714_vm2, %v1567_v3, 0.0  ;;  %v1387_v7 = vpop.eup %1386 }
 0x2cc   : > { %1394 = vpow2.f32 %v755_v4  ;;  %v744_v8 = vsub.f32 %v639_v34, %v732_v5  ;;  %764 = vadd.xlane.f32.xlu1 %v763_v6  ;;  %v814_v9 = vsel %vm803_vm3, %v1387_v7, 0.0  ;;  %v956_v4 = vunpack.c.2.s8 %v949_v53 }
 0x2cd   : > { %v815_v12 = vrot.slane %v814_v9, 4  ;;  %v957_v5 = vunpack.c.3.s8 %v949_v53  ;;  %v1007_v6 = vadd.f32 %v1006_v2, %v1005_v1 }
 0x2ce   : > { %v1572_v10 = vpop.eup %1388  ;;  %v757_v11 = vmul.f32 1.442695, %v744_v8 }
 0x2cf   : > { %v735_v13 = vpop.xlane.xlu1 %734  ;;  %v766_v15 = vsel %vm714_vm2, %v1572_v10, 0.0  ;;  %v816_v17 = vadd.f32 %v815_v12, %v814_v9  ;;  %v1626_v8 = vcvt.s32.f32 %v957_v5 }
 0x2d0   : > { %1396 = vpow2.f32 %v757_v11  ;;  %v745_v16 = vsub.f32 %v1550_v30, %v735_v13  ;;  %767 = vadd.xlane.f32.xlu1 %v766_v15 }
 0x2d1   : > { %v817_v20 = vrot.slane %v816_v17, 2  ;;  %v1010_v11 = vsel %vm714_vm2, %v1626_v8, 0.0 }
 0x2d2   : > { %v1577_v18 = vpop.eup %1390  ;;  %v759_v19 = vmul.f32 1.442695, %v745_v16 }
 0x2d3   : > { %v738_v21 = vpop.xlane.xlu1 %737  ;;  %v769_v22 = vsel %vm714_vm2, %v1577_v18, 0.0  ;;  %v1581_v23 = vpop.eup %1392  ;;  %v818_v25 = vadd.f32 %v817_v20, %v816_v17 }
 0x2d4   : > { %1398 = vpow2.f32 %v759_v19  ;;  %v746_v24 = vsub.f32 %v1553_v33, %v738_v21  ;;  %770 = vadd.xlane.f32.xlu1 %v769_v22  ;;  %v772_v30 = vsel %vm714_vm2, %v1581_v23, 0.0 }
 0x2d5   : > { %v819_v28 = vrot.slane %v818_v25, 1 }
 0x2d6   : > { %v1584_v26 = vpop.eup %1394  ;;  %v761_v27 = vmul.f32 1.442695, %v746_v24 }
 0x2d7   : > { %v775_v29 = vsel %vm714_vm2, %v1584_v26, 0.0  ;;  %v820_v31 = vadd.f32 %v819_v28, %v818_v25 }
 0x2d8   : > { %1400 = vpow2.f32 %v761_v27  ;;  %776 = vadd.xlane.f32.xlu0 %v775_v29  ;;  %773 = vadd.xlane.f32.xlu1 %v772_v30 }
 0x2d9   : > { %1402 = vrcp.f32 %v820_v31 }
 0x2da   : > { %v1590_v32 = vpop.eup %1396 }
 0x2db   : > { %v778_v33 = vsel %vm714_vm2, %v1590_v32, 0.0 }
 0x2dc   : > { %779 = vadd.xlane.f32.xlu1 %v778_v33 }
 0x2de   : > { %v1594_v34 = vpop.eup %1398 }
 0x2df   : > { %v781_v35 = vsel %vm714_vm2, %v1594_v34, 0.0 }
 0x2e0   : > { %782 = vadd.xlane.f32.xlu0 %v781_v35 }
 0x2e2   : > { %v1598_v36 = vpop.eup %1400 }
 0x2e3   : > { %v784_v37 = vsel %vm714_vm2, %v1598_v36, 0.0  ;;  %v1403_v38 = vpop.eup %1402 }
 0x2e4   : > { %785 = vadd.xlane.f32.xlu1 %v784_v37  ;;  %v822_v39 = vmul.f32 %v1403_v38, %v1387_v7  ;;  %v1624_v7 = vcvt.s32.f32 %v956_v4 }
 0x2e6   : > { %v827_v40 = vpack.c.bf16 %v822_v39, %v822_v39  ;;  %v1008_v9 = vsel %vm714_vm2, %v1624_v7, 0.0 }
 0x2e7   : > { %v1009_v12 = vadd.f32 %v1008_v9, %v1007_v6 }
 0x2e8   : > { %v837_v41 = vsel %vm835_vm4, %v827_v40, 0 }
 0x2e9   : > { %1330 = vmatpush3.bf16.msra.mxu1 %v837_v41  ;;  %v1011_v13 = vadd.f32 %v1010_v11, %v1009_v12 }
 0x2ea   : > { %1335 = vmatprep.subr.bf16.mxu1 %v1444_v0 }
 0x2eb   : > { %v1012_v15 = vrot.slane %v1011_v13, 4 }
 0x2ed   : > { %v1013_v16 = vadd.f32 %v1012_v15, %v1011_v13 }
 0x2ef   : > { %v1014_v17 = vrot.slane %v1013_v16, 2 }
 0x2f1   : > { %v1015_v19 = vadd.f32 %v1014_v17, %v1013_v16 }
 0x2f3   : > { %v1016_v20 = vrot.slane %v1015_v19, 1 }
 0x2f5   : > { %v1017_v21 = vadd.f32 %v1016_v20, %v1015_v19 }
 0x2f6   : > { %829 = vrot.lane.b32.xlu0 %v1536_v14, %s1446_s18 }
 0x2f7   : > { %1018 = vst.msk [vmem:[%s416_s10] sm:$0x1] %vm995_vm5, %v1017_v21 }
 0x359   : > { %v765_v22 = vpop.xlane.xlu1 %764 }
 0x35a   : > { %1404 = vrcp.f32 %v765_v22 }
 0x35d   : > { %v768_v24 = vpop.xlane.xlu1 %767 }
 0x35e   : > { %1406 = vrcp.f32 %v768_v24 }
 0x361   : > { %v771_v25 = vpop.xlane.xlu1 %770 }
 0x362   : > { %1408 = vrcp.f32 %v771_v25 }
 0x364   : > { %v1405_v29 = vpop.eup %1404 }
 0x365   : > { %v777_v27 = vpop.xlane.xlu0 %776  ;;  %v774_v28 = vpop.xlane.xlu1 %773  ;;  %v795_v33 = vmul.f32 %v1405_v29, %v1567_v3 }
 0x366   : > { %1410 = vrcp.f32 %v777_v27 }
 0x367   : > { %1412 = vrcp.f32 %v774_v28  ;;  %v966_v40 = vmul.f32 %v958_v45, %v795_v33 }
 0x368   : > { %v1407_v30 = vpop.eup %1406 }
 0x369   : > { %v780_v31 = vpop.xlane.xlu1 %779  ;;  %v796_v35 = vmul.f32 %v1407_v30, %v1572_v10  ;;  %v974_v3 = vsel %vm714_vm2, %v966_v40, 0.0 }
 0x36a   : > { %1414 = vrcp.f32 %v780_v31 }
 0x36b   : > { %v967_v38 = vmul.f32 %v959_v46, %v796_v35  ;;  %v823_v42 = vpack.c.bf16 %v796_v35, %v795_v33 }
 0x36c   : > { %v1409_v37 = vpop.eup %1408 }
 0x36d   : > { %v783_v39 = vpop.xlane.xlu0 %782  ;;  %v797_v41 = vmul.f32 %v1409_v37, %v1577_v18  ;;  %v975_v47 = vsel %vm714_vm2, %v967_v38, 0.0  ;;  %v884_v45 = vsel %vm714_vm2, %v823_v42, 0 }
 0x36e   : > { %1416 = vrcp.f32 %v783_v39 }
 0x36f   : > { %v968_v43 = vmul.f32 %v960_v51, %v797_v41  ;;  %v976_v51 = vadd.f32 %v975_v47, %v974_v3 }
 0x370   : > { %v1411_v44 = vpop.eup %1410 }
 0x371   : > { %v1413_v48 = vpop.eup %1412  ;;  %v830_v49 = vpop.permute.xlu0 %829  ;;  %v799_v10 = vmul.f32 %v1411_v44, %v1584_v26  ;;  %v977_v46 = vsel %vm714_vm2, %v968_v43, 0.0 }
 0x372   : > { %v786_v50 = vpop.xlane.xlu1 %785  ;;  %1332 = vmatmul.mubr.msk.bf16.vlgmr.msra.gmra.mrb[0].mxu1 %vm831_vm6, %v830_v49  ;;  %v798_v18 = vmul.f32 %v1413_v48, %v1581_v23  ;;  %v978_v54 = vadd.f32 %v977_v46, %v976_v51 }
 0x373   : > { %1418 = vrcp.f32 %v786_v50  ;;  %1336 = vmatpush3.bf16.xpose.msra.mxu1 %v884_v45  ;;  %1343 = vmatprep.mubr.msk.bf16.mxu1 %vm1445_vm0, %v1444_v0  ;;  %v970_v56 = vmul.f32 %v1616_v60, %v799_v10 }
 0x374   : > { %v1415_v52 = vpop.eup %1414  ;;  %1337 = vmatprep.subr.bf16.mxu1 %v1444_v0  ;;  %v969_v53 = vmul.f32 %v1612_v55, %v798_v18  ;;  %v824_v57 = vpack.c.bf16 %v798_v18, %v797_v41 }
 0x375   : > { %v800_v26 = vmul.f32 %v1415_v52, %v1590_v32  ;;  %v981_v62 = vsel %vm714_vm2, %v970_v56, 0.0 }
 0x376   : > { %v979_v23 = vsel %vm714_vm2, %v969_v53, 0.0  ;;  %v887_v2 = vsel %vm714_vm2, %v824_v57, 0 }
 0x377   : > { %v980_v58 = vadd.f32 %v979_v23, %v978_v54  ;;  %v971_v59 = vmul.f32 %v1620_v63, %v800_v26  ;;  %v825_v6 = vpack.c.bf16 %v800_v26, %v799_v10 }
 0x378   : > { %v1417_v61 = vpop.eup %1416 }
 0x379   : > { %v801_v1 = vmul.f32 %v1417_v61, %v1594_v34  ;;  %v982_v4 = vadd.f32 %v981_v62, %v980_v58  ;;  %v983_v55 = vsel %vm714_vm2, %v971_v59, 0.0  ;;  %v890_v13 = vsel %vm714_vm2, %v825_v6, 0 }
 0x37b   : > { %1338 = vmatpush3.bf16.xpose.msra.mxu1 %v887_v2  ;;  %v972_v32 = vmul.f32 %v1624_v7, %v801_v1  ;;  %v984_v9 = vadd.f32 %v983_v55, %v982_v4 }
 0x37c   : > { %1339 = vmatprep.subr.bf16.mxu1 %v1444_v0 }
 0x37d   : > { %v1419_v60 = vpop.eup %1418  ;;  %v985_v63 = vsel %vm714_vm2, %v972_v32, 0.0 }
 0x37e   : > { %v802_v5 = vmul.f32 %v1419_v60, %v1598_v36  ;;  %v986_v11 = vadd.f32 %v985_v63, %v984_v9 }
 0x380   : > { %v973_v34 = vmul.f32 %v1626_v8, %v802_v5  ;;  %v826_v16 = vpack.c.bf16 %v802_v5, %v801_v1 }
 0x382   : > { %v987_v12 = vsel %vm714_vm2, %v973_v34, 0.0  ;;  %v893_v19 = vsel %vm714_vm2, %v826_v16, 0 }
 0x383   : > { %v988_v15 = vadd.f32 %v987_v12, %v986_v11  ;;  %1340 = vmatpush3.bf16.xpose.msra.mxu1 %v890_v13 }
 0x384   : > { %1341 = vmatprep.subr.bf16.mxu1 %v1444_v0 }
 0x385   : > { %v989_v7 = vrot.slane %v988_v15, 4 }
 0x387   : > { %v990_v36 = vadd.f32 %v989_v7, %v988_v15 }
 0x389   : > { %v991_v17 = vrot.slane %v990_v36, 2 }
 0x38b   : > { %v992_v20 = vadd.f32 %v991_v17, %v990_v36  ;;  %1342 = vmatpush3.bf16.xpose.msra.mxu1 %v893_v19 }
 0x38d   : > { %v993_v21 = vrot.slane %v992_v20, 1 }
 0x38f   : > { %v994_v8 = vadd.f32 %v993_v21, %v992_v20 }
 0x391   : > { %996 = vst.msk [vmem:[%s410_s13] sm:$0x1] %vm995_vm5, %v994_v8 }
 0x392   : > { %1344 = vmatmul.mubr.msk.bf16.vlgmr.msra.gmra.mrb[0].mxu1 %vm714_vm2, %v1536_v14 }
 0x465   : > { %v929_v0 = vpop.f32.mrb[0].mxu1 }
 0x466   : > { %v1280_v22 = vpack.c.bf16 %v929_v0, %v929_v0  ;;  %v1345_v24 = vpop.f32.mrb[1].mxu1 }
 0x467   : > { %v932_v25 = vpop.f32.mrb[2].mxu1 }
 0x468   : > { %945 = vst.msk [vmem:[%s397_s16] sm:$0xf] %vm944_vm7, %v1280_v22  ;;  %v1281_v27 = vpack.c.bf16 %v932_v25, %v932_v25  ;;  %v1346_v28 = vpop.f32.mrb[3].mxu1 }
 0x46a   : > { %946 = vst.msk [vmem:[%s397_s16 + $0x4] sm:$0xf] %vm944_vm7, %v1281_v27 }
 0x46b PF: > { %s18_s26 = sadd.s32 1, %s1442_s26   ;;  %s1695_s24 = smov %s1438_s25 }
 0x46c   : > { %p15_p5 = scmp.ge.s32.totalorder %s18_s26, 4   ;;  %s1696_s25 = smov %s1698_s27 }
 0x46e   :  { %17 = sbr.rel (!%p15_p5) target bundleno = 2 (0x2), region = 108 }

// kernel: neg.9
= control target key start
LH: loop header
LB: loop body
LE: loop exit
PB: predicated region body
PF: predicated region fallthrough
CT: control target
= control target key end

     0   :  { %s24_s0 = inlined_call_operand.vmem [shape: f32[128], index: 0, kind: input, shape index: {}]   ;;  %s25_s1 = inlined_call_operand.vmem [shape: f32[128], index: 1, kind: output, shape index: {}]  }
   0x1   :  { %v2_v0 = vld [vmem:[%s24_s0] sm:$0x1] }
   0x2   :  { %v5_v1 = vxor.u32 2147483648, %v2_v0 }
   0x4   :  { %7 = vst [vmem:[%s25_s1] sm:$0x1] %v5_v1 }

// kernel: set_abstraction_forward.3
= control target key start
LH: loop header
LB: loop body
LE: loop exit
PB: predicated region body
PF: predicated region fallthrough
CT: control target
= control target key end

     0   :  { %8 = vsyncpa [#allocation3], 0  ;;  %s2359_s0 = inlined_call_operand.vmem [shape: bf16[2,16,19,32], index: 0, kind: input, shape index: {}]   ;;  %s2360_s1 = inlined_call_operand.vmem [shape: bf16[32,19], index: 1, kind: input, shape index: {}]   ;;  %s2361_s2 = inlined_call_operand.vmem [shape: f32[32,1], index: 2, kind: input, shape index: {}]   ;;  %s2362_s3 = inlined_call_operand.hbm [shape: f32[2,32,32], index: 3, kind: output, shape index: {}]  }
   0x1   :  { %10 = vsyncpa [#allocation3 + $0x1], 0  ;;  %s2026_s12 = smov 0   ;;  %s2028_s13 = smov 0  }
   0x2   :  { %s2030_s14 = smov 0   ;;  %s2032_s15 = smov 0  }
   0x3   :  { %s2034_s16 = smov 0   ;;  %s2036_s17 = smov 0  }
   0x4 LB: > { %s1509_s18 = sadd.s32 4294967295, %s1999_s17   ;;  %s1510_s19 = sadd.s32 4294967294, %s1999_s17   ;;  %s1999_s17 = sphi %s2036_s17, %s16_s17   ;;  %s1995_s16 = sphi %s2034_s16, %s2369_s16   ;;  %s1991_s15 = sphi %s2032_s15, %s2368_s15   ;;  %s1987_s14 = sphi %s2030_s14, %s2367_s14   ;;  %s1983_s13 = sphi %s2028_s13, %s2366_s13   ;;  %s1979_s12 = sphi %s2026_s12, %s2365_s12  }
   0x5   : > { %s28_s20 = sadd.s32 1, %s1995_s16  ;;  %s107_s21 = sadd.s32 1, %s1987_s14 }
   0x6   : > { %p30_p0 = scmp.ge.s32.totalorder %s28_s20, 2  ;;  %p117_p1 = scmp.ne.s32.totalorder %s1987_s14, %s1983_s13 }
   0x7   : > { %p118_p2 = scmp.eq.s32.totalorder %s1509_s18, 1  ;;  %p123_p3 = scmp.ne.s32.totalorder %s1983_s13, %s1979_s12 }
   0x8   : > { %s2371_s20 = smov (%p30_p0, %s28_s20), 0  ;;  %p124_p5 = scmp.eq.s32.totalorder %s1510_s19, 1 }
   0x9   : > { %p2066_p4 = por %p118_p2, %p117_p1  ;;  %s102_s23 = ssub.s32 %s1995_s16, %s2371_s20 }
   0xa   : > { %p1513_p6 = scmp.ge.s32.totalorder %s1999_s17, 1  ;;  %p105_p7 = scmp.eq.s32.totalorder %s102_s23, 0 }
   0xb   : > { %p2073_p8 = por %p124_p5, %p123_p3  ;;  %p159_p9 = scmp.lt.s32.totalorder %s1999_s17, 3 }
   0xc   : > { %s2079_s25 = scalar_select %p105_p7, %s1987_s14, %s107_s21  }
   0xd   : > { %p160_p10 = pnand %p1513_p6, %p159_p9 }
   0xe   : > { %p186_p11 = scmp.lt.s32.totalorder (!%p160_p10), %s1991_s15, 1  ;;  %vm252_vm0 = vcmask (!%p160_p10), 1040384   ;;  %v2085_v0 = vld [vmem:[%s2360_s1] sm:$0xff] (!%p160_p10)   ;;  %vm245_vm1 = vcmask (!%p160_p10), 154624   ;;  %v201_v1 = vld [vmem:[%s2361_s2 + $0x10] sm:$0xff] (!%p160_p10)  ;;  %v2001_v3 = vmov (!%p160_p10), 0  }
   0xf   : > { %163 = sbr.rel (%p160_p10) target bundleno = 330 (0x14a), region = 32  ;;  %1701 = vmatprep.mubr.msk.bf16.mxu0 (!%p160_p10), %vm245_vm1, %v2085_v0  ;;  %1709 = vmatprep.mubr.msk.bf16.mxu1 (!%p160_p10), %vm245_vm1, %v2085_v0  ;;  %v199_v2 = vld [vmem:[%s2361_s2] sm:$0xff] (!%p160_p10)  ;;  %vm253_vm2 = vcmask (!%p160_p10), 1041408   ;;  %v2002_v4 = vmov (!%p160_p10), 65535   ;;  %v202_v6 = vld [vmem:[%s2361_s2 + $0x18] sm:$0xff] (!%p160_p10)  ;;  %v200_v7 = vld [vmem:[%s2361_s2 + $0x8] sm:$0xff] (!%p160_p10) }
  0x10   : > { %1886 = vset.pattern.permute.xlu1 (!%p160_p10), %v2001_v3  ;;  %1885 = vset.pattern.permute.xlu0 (!%p160_p10), %v2001_v3  ;;  %v254_v5 = vsel (!%p160_p10), %vm252_vm0, 4294967295, %v2002_v4  ;;  %v2121_v16 = vld [vmem:[%s2360_s1 + $0x8] sm:$0xff] (!%p160_p10)   ;;  %s183_s26 = sand.u32 (!%p160_p10), 1, %s1983_s13   ;;  %vm1411_vm3 = vcmask (!%p160_p10), 261120   ;;  %s2003_s8 = smov (!%p160_p10), [#allocation2]  }
  0x11   : > { %218 = vperm.xlu1 (!%p160_p10), %1886, %v201_v1   ;;  %208 = vperm.xlu0 (!%p160_p10), %1885, %v199_v2   ;;  %v2111_v10 = vsel (!%p160_p10), %vm253_vm2, %v254_v5, 0  ;;  %s1514_s27 = sshll.u32 (!%p160_p10), %s183_s26, 5 }
  0x12   : > { %s185_s29 = scalar_lea.vmem (!%p160_p10), [#allocation2], %s1514_s27 }
  0x13   : > { %s1431_s30 = sshll.u32 (!%p160_p10), %s185_s29, 4  ;;  %s2306_s30 = int_to_ptr.vmem [resolvable:$true] %s1431_s30 }
  0x14   : > { %s1921_s7 = scalar_lea.vmem (!%p160_p10), %s2306_s30, 512 }
  0x15   : > { %223 = vperm.xlu1 (!%p160_p10), %1886, %v202_v6   ;;  %213 = vperm.xlu0 (!%p160_p10), %1885, %v200_v7   ;;  %p1922_p12 = scmp.ne.s32.totalorder (!%p160_p10), %s2306_s30, %s1921_s7 }
  0x16   : > { %s187_s28 = scalar_select %p186_p11, %s1991_s15, 1 }
  0x17   : > { %p1923_p13 = pnand %p1922_p12, %p2066_p4 }
  0x18   : > { %s1825_s6 = smul.u32 192, %s187_s28  ;;  %s1632_s28 = sshll.u32 %s1991_s15, 9 }
  0x19   : > { %s2313_s15 = scalar_lea.sflag [#allocation3], %s183_s26  ;;  %p1924_p0 = pneg %p1923_p13 }
  0x1a   : > { %s2101_s9 = scalar_lea.vmem %s2359_s0, %s1825_s6  ;;  %s2304_s6 = scalar_lea.hbm %s2362_s3, %s1632_s28 }
  0x1b   : > { %v1887_v8 = vld [vmem:[%s2101_s9] sm:$0xff]   ;;  %v1888_v9 = vld [vmem:[%s2101_s9 + $0xc] sm:$0xff]   ;;  %v1889_v11 = vld [vmem:[%s2101_s9 + $0x8] ss:$0 sps:$4 sm:$0x33]  }
  0x1c   : > { %1697 = vmatprep.subr.bf16.mxu0 %v1887_v8  ;;  %v1893_v12 = vld [vmem:[%s2101_s9 + $0x18] sm:$0xff]   ;;  %1705 = vmatprep.subr.bf16.mxu1 %v1888_v9  ;;  %v1890_v13 = vld [vmem:[%s2101_s9 + $0x14] ss:$0 sps:$4 sm:$0x33]   ;;  %v1894_v14 = vld [vmem:[%s2101_s9 + $0x24] sm:$0xff]   ;;  %v257_v15 = vand.u32 %v1889_v11, %v2111_v10 }
  0x1d   : > { %1698 = vmatpush3.bf16.msra.mxu0 %v1887_v8  ;;  %1706 = vmatpush3.bf16.msra.mxu1 %v1888_v9  ;;  %v330_v17 = vand.u32 %v1890_v13, %v2111_v10  ;;  %v1895_v18 = vld [vmem:[%s2101_s9 + $0x20] ss:$0 sps:$4 sm:$0x33]   ;;  %v1896_v19 = vld [vmem:[%s2101_s9 + $0x2c] ss:$0 sps:$4 sm:$0x33]  }
  0x1e   : > { %1699 = vmatprep.subr.bf16.mxu0 %v257_v15  ;;  %v403_v20 = vand.u32 %v1895_v18, %v2111_v10  ;;  %v476_v21 = vand.u32 %v1896_v19, %v2111_v10  ;;  %v1897_v22 = vld [vmem:[%s2101_s9 + $0x30] sm:$0xff]   ;;  %v1899_v23 = vld [vmem:[%s2101_s9 + $0x38] ss:$0 sps:$4 sm:$0x33]   ;;  %v1898_v24 = vld [vmem:[%s2101_s9 + $0x3c] sm:$0xff]  }
  0x1f   : > { %1707 = vmatprep.subr.bf16.mxu1 %v330_v17  ;;  %v1900_v25 = vld [vmem:[%s2101_s9 + $0x44] ss:$0 sps:$4 sm:$0x33]   ;;  %v549_v26 = vand.u32 %v1899_v23, %v2111_v10  ;;  %v1901_v28 = vld [vmem:[%s2101_s9 + $0x48] sm:$0xff]   ;;  %v1902_v31 = vld [vmem:[%s2101_s9 + $0x54] sm:$0xff]  }
  0x20   : > { %v622_v27 = vand.u32 %v1900_v25, %v2111_v10  ;;  %v1903_v29 = vld [vmem:[%s2101_s9 + $0x50] ss:$0 sps:$4 sm:$0x33]   ;;  %v1904_v30 = vld [vmem:[%s2101_s9 + $0x5c] ss:$0 sps:$4 sm:$0x33]  }
  0x21   : > { %1700 = vmatpush3.bf16.msra.mxu0 %v257_v15  ;;  %1708 = vmatpush3.bf16.msra.mxu1 %v330_v17  ;;  %v695_v32 = vand.u32 %v1903_v29, %v2111_v10  ;;  %v768_v33 = vand.u32 %v1904_v30, %v2111_v10  ;;  %v1905_v34 = vld [vmem:[%s2101_s9 + $0x60] sm:$0xff]   ;;  %v1907_v35 = vld [vmem:[%s2101_s9 + $0x68] ss:$0 sps:$4 sm:$0x33]   ;;  %v1906_v36 = vld [vmem:[%s2101_s9 + $0x6c] sm:$0xff]  }
  0x22   : > { %1713 = vmatprep.subr.bf16.mxu0 %v1893_v12  ;;  %1721 = vmatprep.subr.bf16.mxu1 %v1894_v14  ;;  %v1908_v37 = vld [vmem:[%s2101_s9 + $0x74] ss:$0 sps:$4 sm:$0x33]   ;;  %v841_v38 = vand.u32 %v1907_v35, %v2111_v10  ;;  %v1909_v40 = vld [vmem:[%s2101_s9 + $0x78] sm:$0xff]   ;;  %v1910_v42 = vld [vmem:[%s2101_s9 + $0x84] sm:$0xff]  }
  0x23   : > { %v914_v39 = vand.u32 %v1908_v37, %v2111_v10  ;;  %v1911_v41 = vld [vmem:[%s2101_s9 + $0x80] ss:$0 sps:$4 sm:$0x33]   ;;  %v1912_v43 = vld [vmem:[%s2101_s9 + $0x8c] ss:$0 sps:$4 sm:$0x33]  }
  0x24   : > { %1702 = vmatmul.mubr.msk.bf16.vlgmr.msra.gmra.mrb[0].mxu0 %vm245_vm1, %v2121_v16  ;;  %1710 = vmatmul.mubr.msk.bf16.vlgmr.msra.gmra.mrb[0].mxu1 %vm245_vm1, %v2121_v16  ;;  %v987_v44 = vand.u32 %v1911_v41, %v2111_v10  ;;  %v1060_v45 = vand.u32 %v1912_v43, %v2111_v10  ;;  %v1913_v46 = vld [vmem:[%s2101_s9 + $0x90] sm:$0xff]   ;;  %v1915_v47 = vld [vmem:[%s2101_s9 + $0x98] ss:$0 sps:$4 sm:$0x33]   ;;  %v1914_v48 = vld [vmem:[%s2101_s9 + $0x9c] sm:$0xff]  }
  0x25   : > { %1714 = vmatpush3.bf16.msra.mxu0 %v1893_v12  ;;  %1722 = vmatpush3.bf16.msra.mxu1 %v1894_v14  ;;  %v1916_v49 = vld [vmem:[%s2101_s9 + $0xa4] ss:$0 sps:$4 sm:$0x33]   ;;  %v1133_v50 = vand.u32 %v1915_v47, %v2111_v10  ;;  %v1917_v52 = vld [vmem:[%s2101_s9 + $0xa8] sm:$0xff]   ;;  %v1918_v54 = vld [vmem:[%s2101_s9 + $0xb4] sm:$0xff]  }
  0x26   : > { %1715 = vmatprep.subr.bf16.mxu0 %v403_v20  ;;  %1723 = vmatprep.subr.bf16.mxu1 %v476_v21  ;;  %v1206_v51 = vand.u32 %v1916_v49, %v2111_v10  ;;  %v1919_v53 = vld [vmem:[%s2101_s9 + $0xb0] ss:$0 sps:$4 sm:$0x33]   ;;  %v1920_v55 = vld [vmem:[%s2101_s9 + $0xbc] ss:$0 sps:$4 sm:$0x33]  }
  0x27   : > { %1717 = vmatprep.mubr.msk.bf16.mxu0 %vm245_vm1, %v2085_v0  ;;  %1725 = vmatprep.mubr.msk.bf16.mxu1 %vm245_vm1, %v2085_v0  ;;  %v1279_v56 = vand.u32 %v1919_v53, %v2111_v10  ;;  %v1352_v57 = vand.u32 %v1920_v55, %v2111_v10  ;;  %s1925_s9 = sshll.u32 %s2003_s8, 4  ;;  %s1926_s9 = int_to_ptr.vmem [resolvable:$false] %s1925_s9 }
  0x28   : > { %s1927_s10 = scalar_lea.vmem %s1926_s9, 1024  ;;  %p1928_p1 = scmp.lt.s32.totalorder %s2306_s30, %s1926_s9 }
  0x29   : > { %1716 = vmatpush3.bf16.msra.mxu0 %v403_v20  ;;  %1724 = vmatpush3.bf16.msra.mxu1 %v476_v21  ;;  %p1929_p2 = scmp.lt.s32.totalorder %s1927_s10, %s1921_s7 }
  0x2a   : > { %1729 = vmatprep.subr.bf16.mxu0 %v1897_v22  ;;  %1737 = vmatprep.subr.bf16.mxu1 %v1898_v24 }
  0x2b   : > { %p1930_p3 = por %p1929_p2, %p1928_p1 }
  0x2c   : > { %1718 = vmatmul.mubr.msk.bf16.vlgmr.msra.gmra.mrb[4].mxu0 %vm245_vm1, %v2121_v16  ;;  %1726 = vmatmul.mubr.msk.bf16.vlgmr.msra.gmra.mrb[4].mxu1 %vm245_vm1, %v2121_v16 }
  0x2d   : > { %1730 = vmatpush3.bf16.msra.mxu0 %v1897_v22  ;;  %1738 = vmatpush3.bf16.msra.mxu1 %v1898_v24  ;;  %p1931_p5 = pnand %p1930_p3, %p1924_p0 }
  0x2e   : > { %1731 = vmatprep.subr.bf16.mxu0 %v549_v26  ;;  %1739 = vmatprep.subr.bf16.mxu1 %v622_v27 }
  0x2f   : > { %1733 = vmatprep.mubr.msk.bf16.mxu0 %vm245_vm1, %v2085_v0  ;;  %1741 = vmatprep.mubr.msk.bf16.mxu1 %vm245_vm1, %v2085_v0 }
  0x31   : > { %1732 = vmatpush3.bf16.msra.mxu0 %v549_v26  ;;  %1740 = vmatpush3.bf16.msra.mxu1 %v622_v27 }
  0x32   : > { %1745 = vmatprep.subr.bf16.mxu0 %v1901_v28  ;;  %1753 = vmatprep.subr.bf16.mxu1 %v1902_v31 }
  0x34   : > { %1734 = vmatmul.mubr.msk.bf16.vlgmr.msra.gmra.mrb[8].mxu0 %vm245_vm1, %v2121_v16  ;;  %1742 = vmatmul.mubr.msk.bf16.vlgmr.msra.gmra.mrb[8].mxu1 %vm245_vm1, %v2121_v16 }
  0x35   : > { %1746 = vmatpush3.bf16.msra.mxu0 %v1901_v28  ;;  %1754 = vmatpush3.bf16.msra.mxu1 %v1902_v31 }
  0x36   : > { %1747 = vmatprep.subr.bf16.mxu0 %v695_v32  ;;  %1755 = vmatprep.subr.bf16.mxu1 %v768_v33 }
  0x37   : > { %1749 = vmatprep.mubr.msk.bf16.mxu0 %vm245_vm1, %v2085_v0  ;;  %1757 = vmatprep.mubr.msk.bf16.mxu1 %vm245_vm1, %v2085_v0 }
  0x39   : > { %1748 = vmatpush3.bf16.msra.mxu0 %v695_v32  ;;  %1756 = vmatpush3.bf16.msra.mxu1 %v768_v33 }
  0x3a   : > { %1761 = vmatprep.subr.bf16.mxu0 %v1905_v34  ;;  %1769 = vmatprep.subr.bf16.mxu1 %v1906_v36 }
  0x3c   : > { %1750 = vmatmul.mubr.msk.bf16.vlgmr.msra.gmra.mrb[12].mxu0 %vm245_vm1, %v2121_v16  ;;  %1758 = vmatmul.mubr.msk.bf16.vlgmr.msra.gmra.mrb[12].mxu1 %vm245_vm1, %v2121_v16 }
  0x3d   : > { %1762 = vmatpush3.bf16.msra.mxu0 %v1905_v34  ;;  %1770 = vmatpush3.bf16.msra.mxu1 %v1906_v36 }
  0x3e   : > { %1763 = vmatprep.subr.bf16.mxu0 %v841_v38  ;;  %1771 = vmatprep.subr.bf16.mxu1 %v914_v39 }
  0x3f   : > { %1765 = vmatprep.mubr.msk.bf16.mxu0 %vm245_vm1, %v2085_v0  ;;  %1773 = vmatprep.mubr.msk.bf16.mxu1 %vm245_vm1, %v2085_v0 }
  0x41   : > { %1764 = vmatpush3.bf16.msra.mxu0 %v841_v38  ;;  %1772 = vmatpush3.bf16.msra.mxu1 %v914_v39 }
  0x42   : > { %1777 = vmatprep.subr.bf16.mxu0 %v1909_v40  ;;  %1785 = vmatprep.subr.bf16.mxu1 %v1910_v42 }
  0x44   : > { %1766 = vmatmul.mubr.msk.bf16.vlgmr.msra.gmra.mrb[16].mxu0 %vm245_vm1, %v2121_v16  ;;  %1774 = vmatmul.mubr.msk.bf16.vlgmr.msra.gmra.mrb[16].mxu1 %vm245_vm1, %v2121_v16 }
  0x45   : > { %1778 = vmatpush3.bf16.msra.mxu0 %v1909_v40  ;;  %1786 = vmatpush3.bf16.msra.mxu1 %v1910_v42 }
  0x46   : > { %1779 = vmatprep.subr.bf16.mxu0 %v987_v44  ;;  %1787 = vmatprep.subr.bf16.mxu1 %v1060_v45 }
  0x47   : > { %1781 = vmatprep.mubr.msk.bf16.mxu0 %vm245_vm1, %v2085_v0  ;;  %1789 = vmatprep.mubr.msk.bf16.mxu1 %vm245_vm1, %v2085_v0 }
  0x49   : > { %1780 = vmatpush3.bf16.msra.mxu0 %v987_v44  ;;  %1788 = vmatpush3.bf16.msra.mxu1 %v1060_v45 }
  0x4a   : > { %1793 = vmatprep.subr.bf16.mxu0 %v1913_v46  ;;  %1801 = vmatprep.subr.bf16.mxu1 %v1914_v48 }
  0x4c   : > { %1782 = vmatmul.mubr.msk.bf16.vlgmr.msra.gmra.mrb[20].mxu0 %vm245_vm1, %v2121_v16  ;;  %1790 = vmatmul.mubr.msk.bf16.vlgmr.msra.gmra.mrb[20].mxu1 %vm245_vm1, %v2121_v16 }
  0x4d   : > { %1794 = vmatpush3.bf16.msra.mxu0 %v1913_v46  ;;  %1802 = vmatpush3.bf16.msra.mxu1 %v1914_v48 }
  0x4e   : > { %1795 = vmatprep.subr.bf16.mxu0 %v1133_v50  ;;  %1803 = vmatprep.subr.bf16.mxu1 %v1206_v51 }
  0x4f   : > { %1797 = vmatprep.mubr.msk.bf16.mxu0 %vm245_vm1, %v2085_v0  ;;  %1805 = vmatprep.mubr.msk.bf16.mxu1 %vm245_vm1, %v2085_v0 }
  0x51   : > { %1796 = vmatpush3.bf16.msra.mxu0 %v1133_v50  ;;  %1804 = vmatpush3.bf16.msra.mxu1 %v1206_v51 }
  0x52   : > { %1809 = vmatprep.subr.bf16.mxu0 %v1917_v52  ;;  %1817 = vmatprep.subr.bf16.mxu1 %v1918_v54 }
  0x54   : > { %1798 = vmatmul.mubr.msk.bf16.vlgmr.msra.gmra.mrb[24].mxu0 %vm245_vm1, %v2121_v16  ;;  %1806 = vmatmul.mubr.msk.bf16.vlgmr.msra.gmra.mrb[24].mxu1 %vm245_vm1, %v2121_v16 }
  0x55   : > { %1810 = vmatpush3.bf16.msra.mxu0 %v1917_v52  ;;  %1818 = vmatpush3.bf16.msra.mxu1 %v1918_v54 }
  0x56   : > { %1811 = vmatprep.subr.bf16.mxu0 %v1279_v56  ;;  %1819 = vmatprep.subr.bf16.mxu1 %v1352_v57 }
  0x57   : > { %1813 = vmatprep.mubr.msk.bf16.mxu0 %vm245_vm1, %v2085_v0  ;;  %1821 = vmatprep.mubr.msk.bf16.mxu1 %vm245_vm1, %v2085_v0 }
  0x59   : > { %1812 = vmatpush3.bf16.msra.mxu0 %v1279_v56  ;;  %1820 = vmatpush3.bf16.msra.mxu1 %v1352_v57 }
  0x5c   : > { %1814 = vmatmul.mubr.msk.bf16.vlgmr.msra.gmra.mrb[28].mxu0 %vm245_vm1, %v2121_v16  ;;  %1822 = vmatmul.mubr.msk.bf16.vlgmr.msra.gmra.mrb[28].mxu1 %vm245_vm1, %v2121_v16 }
  0x90   : > { %v2224_v58 = vpop.permute.xlu1 %218  ;;  %v2226_v59 = vpop.permute.xlu0 %208 }
  0x94   : > { %v2228_v60 = vpop.permute.xlu1 %223  ;;  %v2230_v62 = vpop.permute.xlu0 %213 }
  0xf7   : > { %v1703_v61 = vpop.f32.mrb[0].mxu0  ;;  %v1711_v0 = vpop.f32.mrb[0].mxu1 }
  0xf8   : > { %v302_v63 = vadd.f32 %v1703_v61, %v2224_v58  ;;  %v293_v1 = vpop.f32.mrb[1].mxu0  ;;  %v375_v2 = vadd.f32 %v1711_v0, %v2224_v58  ;;  %v366_v4 = vpop.f32.mrb[1].mxu1 }
  0xf9   : > { %v294_v3 = vadd.f32 %v293_v1, %v2226_v59  ;;  %v1704_v5 = vpop.f32.mrb[2].mxu0  ;;  %v367_v7 = vadd.f32 %v366_v4, %v2226_v59  ;;  %v1712_v9 = vpop.f32.mrb[2].mxu1 }
  0xfa   : > { %v310_v6 = vmax.f32 %v302_v63, 0.0  ;;  %v305_v8 = vadd.f32 %v1704_v5, %v2228_v60  ;;  %v296_v10 = vpop.f32.mrb[3].mxu0  ;;  %v383_v11 = vmax.f32 %v375_v2, 0.0  ;;  %v378_v13 = vadd.f32 %v1712_v9, %v2228_v60  ;;  %v369_v15 = vpop.f32.mrb[3].mxu1 }
  0xfb   : > { %v308_v12 = vmax.f32 %v294_v3, 0.0  ;;  %v297_v14 = vadd.f32 %v296_v10, %v2230_v62  ;;  %v381_v17 = vmax.f32 %v367_v7, 0.0  ;;  %v370_v19 = vadd.f32 %v369_v15, %v2230_v62 }
  0xfc   : > { %v314_v16 = vmax.f32 %v310_v6, 0.0  ;;  %v311_v18 = vmax.f32 %v305_v8, 0.0  ;;  %v384_v24 = vmax.f32 %v378_v13, 0.0 }
  0xfd   : > { %v312_v20 = vmax.f32 %v308_v12, 0.0  ;;  %v309_v21 = vmax.f32 %v297_v14, 0.0  ;;  %v382_v27 = vmax.f32 %v370_v19, 0.0 }
  0xfe   : > { %v387_v22 = vmax.f32 %v314_v16, %v383_v11  ;;  %v315_v23 = vmax.f32 %v311_v18, 0.0 }
  0xff   : > { %v385_v25 = vmax.f32 %v312_v20, %v381_v17  ;;  %v313_v26 = vmax.f32 %v309_v21, 0.0  ;;  %v1719_v28 = vpop.f32.mrb[4].mxu0  ;;  %v1727_v31 = vpop.f32.mrb[4].mxu1 }
 0x100   : > { %v388_v29 = vmax.f32 %v315_v23, %v384_v24  ;;  %v448_v30 = vadd.f32 %v1719_v28, %v2224_v58  ;;  %v439_v32 = vpop.f32.mrb[5].mxu0  ;;  %v521_v34 = vadd.f32 %v1727_v31, %v2224_v58  ;;  %v512_v36 = vpop.f32.mrb[5].mxu1 }
 0x101   : > { %v386_v33 = vmax.f32 %v313_v26, %v382_v27  ;;  %v440_v35 = vadd.f32 %v439_v32, %v2226_v59  ;;  %v1720_v37 = vpop.f32.mrb[6].mxu0  ;;  %v513_v39 = vadd.f32 %v512_v36, %v2226_v59  ;;  %v1728_v41 = vpop.f32.mrb[6].mxu1 }
 0x102   : > { %v456_v38 = vmax.f32 %v448_v30, 0.0  ;;  %v451_v40 = vadd.f32 %v1720_v37, %v2228_v60  ;;  %v442_v42 = vpop.f32.mrb[7].mxu0  ;;  %v529_v43 = vmax.f32 %v521_v34, 0.0  ;;  %v524_v45 = vadd.f32 %v1728_v41, %v2228_v60  ;;  %v515_v47 = vpop.f32.mrb[7].mxu1 }
 0x103   : > { %v454_v44 = vmax.f32 %v440_v35, 0.0  ;;  %v443_v46 = vadd.f32 %v442_v42, %v2230_v62  ;;  %v527_v49 = vmax.f32 %v513_v39, 0.0  ;;  %v516_v51 = vadd.f32 %v515_v47, %v2230_v62 }
 0x104   : > { %v460_v48 = vmax.f32 %v387_v22, %v456_v38  ;;  %v457_v50 = vmax.f32 %v451_v40, 0.0  ;;  %v530_v56 = vmax.f32 %v524_v45, 0.0 }
 0x105   : > { %v458_v52 = vmax.f32 %v385_v25, %v454_v44  ;;  %v455_v53 = vmax.f32 %v443_v46, 0.0  ;;  %v528_v63 = vmax.f32 %v516_v51, 0.0 }
 0x106   : > { %v533_v54 = vmax.f32 %v460_v48, %v529_v43  ;;  %v461_v55 = vmax.f32 %v388_v29, %v457_v50 }
 0x107   : > { %v531_v57 = vmax.f32 %v458_v52, %v527_v49  ;;  %v459_v61 = vmax.f32 %v386_v33, %v455_v53  ;;  %v1735_v0 = vpop.f32.mrb[8].mxu0  ;;  %v1743_v3 = vpop.f32.mrb[8].mxu1 }
 0x108   : > { %v534_v1 = vmax.f32 %v461_v55, %v530_v56  ;;  %v594_v2 = vadd.f32 %v1735_v0, %v2224_v58  ;;  %v585_v4 = vpop.f32.mrb[9].mxu0  ;;  %v667_v6 = vadd.f32 %v1743_v3, %v2224_v58  ;;  %v658_v8 = vpop.f32.mrb[9].mxu1 }
 0x109   : > { %v532_v5 = vmax.f32 %v459_v61, %v528_v63  ;;  %v586_v7 = vadd.f32 %v585_v4, %v2226_v59  ;;  %v1736_v9 = vpop.f32.mrb[10].mxu0  ;;  %v659_v11 = vadd.f32 %v658_v8, %v2226_v59  ;;  %v1744_v13 = vpop.f32.mrb[10].mxu1 }
 0x10a   : > { %v602_v10 = vmax.f32 %v594_v2, 0.0  ;;  %v597_v12 = vadd.f32 %v1736_v9, %v2228_v60  ;;  %v588_v14 = vpop.f32.mrb[11].mxu0  ;;  %v675_v15 = vmax.f32 %v667_v6, 0.0  ;;  %v670_v17 = vadd.f32 %v1744_v13, %v2228_v60  ;;  %v661_v19 = vpop.f32.mrb[11].mxu1 }
 0x10b   : > { %v600_v16 = vmax.f32 %v586_v7, 0.0  ;;  %v589_v18 = vadd.f32 %v588_v14, %v2230_v62  ;;  %v673_v21 = vmax.f32 %v659_v11, 0.0  ;;  %v662_v23 = vadd.f32 %v661_v19, %v2230_v62 }
 0x10c   : > { %v606_v20 = vmax.f32 %v533_v54, %v602_v10  ;;  %v603_v22 = vmax.f32 %v597_v12, 0.0  ;;  %v676_v28 = vmax.f32 %v670_v17, 0.0 }
 0x10d   : > { %v604_v24 = vmax.f32 %v531_v57, %v600_v16  ;;  %v601_v25 = vmax.f32 %v589_v18, 0.0  ;;  %v674_v31 = vmax.f32 %v662_v23, 0.0 }
 0x10e   : > { %v679_v26 = vmax.f32 %v606_v20, %v675_v15  ;;  %v607_v27 = vmax.f32 %v534_v1, %v603_v22 }
 0x10f   : > { %v677_v29 = vmax.f32 %v604_v24, %v673_v21  ;;  %v605_v30 = vmax.f32 %v532_v5, %v601_v25  ;;  %v1751_v32 = vpop.f32.mrb[12].mxu0  ;;  %v1759_v35 = vpop.f32.mrb[12].mxu1 }
 0x110   : > { %v680_v33 = vmax.f32 %v607_v27, %v676_v28  ;;  %v740_v34 = vadd.f32 %v1751_v32, %v2224_v58  ;;  %v731_v36 = vpop.f32.mrb[13].mxu0  ;;  %v813_v38 = vadd.f32 %v1759_v35, %v2224_v58  ;;  %v804_v40 = vpop.f32.mrb[13].mxu1 }
 0x111   : > { %v678_v37 = vmax.f32 %v605_v30, %v674_v31  ;;  %v732_v39 = vadd.f32 %v731_v36, %v2226_v59  ;;  %v1752_v41 = vpop.f32.mrb[14].mxu0  ;;  %v805_v43 = vadd.f32 %v804_v40, %v2226_v59  ;;  %v1760_v45 = vpop.f32.mrb[14].mxu1 }
 0x112   : > { %v748_v42 = vmax.f32 %v740_v34, 0.0  ;;  %v743_v44 = vadd.f32 %v1752_v41, %v2228_v60  ;;  %v734_v46 = vpop.f32.mrb[15].mxu0  ;;  %v821_v47 = vmax.f32 %v813_v38, 0.0  ;;  %v816_v49 = vadd.f32 %v1760_v45, %v2228_v60  ;;  %v807_v51 = vpop.f32.mrb[15].mxu1 }
 0x113   : > { %v746_v48 = vmax.f32 %v732_v39, 0.0  ;;  %v735_v50 = vadd.f32 %v734_v46, %v2230_v62  ;;  %v819_v53 = vmax.f32 %v805_v43, 0.0  ;;  %v808_v55 = vadd.f32 %v807_v51, %v2230_v62 }
 0x114   : > { %v752_v52 = vmax.f32 %v679_v26, %v748_v42  ;;  %v749_v54 = vmax.f32 %v743_v44, 0.0  ;;  %v822_v0 = vmax.f32 %v816_v49, 0.0 }
 0x115   : > { %v750_v56 = vmax.f32 %v677_v29, %v746_v48  ;;  %v747_v57 = vmax.f32 %v735_v50, 0.0  ;;  %v820_v3 = vmax.f32 %v808_v55, 0.0 }
 0x116   : > { %v825_v61 = vmax.f32 %v752_v52, %v821_v47  ;;  %v753_v63 = vmax.f32 %v680_v33, %v749_v54 }
 0x117   : > { %v823_v1 = vmax.f32 %v750_v56, %v819_v53  ;;  %v751_v2 = vmax.f32 %v678_v37, %v747_v57  ;;  %v1767_v4 = vpop.f32.mrb[16].mxu0  ;;  %v1775_v7 = vpop.f32.mrb[16].mxu1 }
 0x118   : > { %v826_v5 = vmax.f32 %v753_v63, %v822_v0  ;;  %v886_v6 = vadd.f32 %v1767_v4, %v2224_v58  ;;  %v877_v8 = vpop.f32.mrb[17].mxu0  ;;  %v959_v10 = vadd.f32 %v1775_v7, %v2224_v58  ;;  %v950_v12 = vpop.f32.mrb[17].mxu1 }
 0x119   : > { %v824_v9 = vmax.f32 %v751_v2, %v820_v3  ;;  %v878_v11 = vadd.f32 %v877_v8, %v2226_v59  ;;  %v1768_v13 = vpop.f32.mrb[18].mxu0  ;;  %v951_v15 = vadd.f32 %v950_v12, %v2226_v59  ;;  %v1776_v17 = vpop.f32.mrb[18].mxu1 }
 0x11a   : > { %v894_v14 = vmax.f32 %v886_v6, 0.0  ;;  %v889_v16 = vadd.f32 %v1768_v13, %v2228_v60  ;;  %v880_v18 = vpop.f32.mrb[19].mxu0  ;;  %v962_v20 = vadd.f32 %v1776_v17, %v2228_v60  ;;  %v953_v22 = vpop.f32.mrb[19].mxu1  ;;  %v967_v24 = vmax.f32 %v959_v10, 0.0 }
 0x11b   : > { %v892_v19 = vmax.f32 %v878_v11, 0.0  ;;  %v881_v21 = vadd.f32 %v880_v18, %v2230_v62  ;;  %v954_v26 = vadd.f32 %v953_v22, %v2230_v62  ;;  %v965_v28 = vmax.f32 %v951_v15, 0.0 }
 0x11c   : > { %v898_v23 = vmax.f32 %v825_v61, %v894_v14  ;;  %v895_v25 = vmax.f32 %v889_v16, 0.0  ;;  %v968_v32 = vmax.f32 %v962_v20, 0.0 }
 0x11d   : > { %v896_v27 = vmax.f32 %v823_v1, %v892_v19  ;;  %v893_v29 = vmax.f32 %v881_v21, 0.0  ;;  %v966_v35 = vmax.f32 %v954_v26, 0.0 }
 0x11e   : > { %v971_v30 = vmax.f32 %v898_v23, %v967_v24  ;;  %v899_v31 = vmax.f32 %v826_v5, %v895_v25 }
 0x11f   : > { %v969_v33 = vmax.f32 %v896_v27, %v965_v28  ;;  %v897_v34 = vmax.f32 %v824_v9, %v893_v29  ;;  %v1783_v36 = vpop.f32.mrb[20].mxu0  ;;  %v1791_v39 = vpop.f32.mrb[20].mxu1 }
 0x120   : > { %v972_v37 = vmax.f32 %v899_v31, %v968_v32  ;;  %v1032_v38 = vadd.f32 %v1783_v36, %v2224_v58  ;;  %v1023_v40 = vpop.f32.mrb[21].mxu0  ;;  %v1105_v42 = vadd.f32 %v1791_v39, %v2224_v58  ;;  %v1096_v44 = vpop.f32.mrb[21].mxu1 }
 0x121   : > { %v970_v41 = vmax.f32 %v897_v34, %v966_v35  ;;  %v1024_v43 = vadd.f32 %v1023_v40, %v2226_v59  ;;  %v1784_v45 = vpop.f32.mrb[22].mxu0  ;;  %v1097_v47 = vadd.f32 %v1096_v44, %v2226_v59  ;;  %v1792_v49 = vpop.f32.mrb[22].mxu1 }
 0x122   : > { %v1040_v46 = vmax.f32 %v1032_v38, 0.0  ;;  %v1035_v48 = vadd.f32 %v1784_v45, %v2228_v60  ;;  %v1026_v50 = vpop.f32.mrb[23].mxu0  ;;  %v1108_v52 = vadd.f32 %v1792_v49, %v2228_v60  ;;  %v1099_v54 = vpop.f32.mrb[23].mxu1  ;;  %v1113_v56 = vmax.f32 %v1105_v42, 0.0 }
 0x123   : > { %v1038_v51 = vmax.f32 %v1024_v43, 0.0  ;;  %v1027_v53 = vadd.f32 %v1026_v50, %v2230_v62  ;;  %v1100_v61 = vadd.f32 %v1099_v54, %v2230_v62  ;;  %v1111_v0 = vmax.f32 %v1097_v47, 0.0 }
 0x124   : > { %v1044_v55 = vmax.f32 %v971_v30, %v1040_v46  ;;  %v1041_v57 = vmax.f32 %v1035_v48, 0.0  ;;  %v1114_v4 = vmax.f32 %v1108_v52, 0.0 }
 0x125   : > { %v1042_v63 = vmax.f32 %v969_v33, %v1038_v51  ;;  %v1039_v1 = vmax.f32 %v1027_v53, 0.0  ;;  %v1112_v7 = vmax.f32 %v1100_v61, 0.0 }
 0x126   : > { %v1117_v2 = vmax.f32 %v1044_v55, %v1113_v56  ;;  %v1045_v3 = vmax.f32 %v972_v37, %v1041_v57 }
 0x127   : > { %v1115_v5 = vmax.f32 %v1042_v63, %v1111_v0  ;;  %v1043_v6 = vmax.f32 %v970_v41, %v1039_v1  ;;  %v1799_v8 = vpop.f32.mrb[24].mxu0  ;;  %v1807_v11 = vpop.f32.mrb[24].mxu1 }
 0x128   : > { %v1118_v9 = vmax.f32 %v1045_v3, %v1114_v4  ;;  %v1178_v10 = vadd.f32 %v1799_v8, %v2224_v58  ;;  %v1169_v12 = vpop.f32.mrb[25].mxu0  ;;  %v1251_v14 = vadd.f32 %v1807_v11, %v2224_v58  ;;  %v1242_v16 = vpop.f32.mrb[25].mxu1 }
 0x129   : > { %v1116_v13 = vmax.f32 %v1043_v6, %v1112_v7  ;;  %v1170_v15 = vadd.f32 %v1169_v12, %v2226_v59  ;;  %v1800_v17 = vpop.f32.mrb[26].mxu0  ;;  %v1243_v19 = vadd.f32 %v1242_v16, %v2226_v59  ;;  %v1808_v21 = vpop.f32.mrb[26].mxu1 }
 0x12a   : > { %v1186_v18 = vmax.f32 %v1178_v10, 0.0  ;;  %v1181_v20 = vadd.f32 %v1800_v17, %v2228_v60  ;;  %v1172_v22 = vpop.f32.mrb[27].mxu0  ;;  %v1254_v24 = vadd.f32 %v1808_v21, %v2228_v60  ;;  %v1245_v26 = vpop.f32.mrb[27].mxu1  ;;  %v1259_v28 = vmax.f32 %v1251_v14, 0.0 }
 0x12b   : > { %v1184_v23 = vmax.f32 %v1170_v15, 0.0  ;;  %v1173_v25 = vadd.f32 %v1172_v22, %v2230_v62  ;;  %v1246_v30 = vadd.f32 %v1245_v26, %v2230_v62  ;;  %v1257_v32 = vmax.f32 %v1243_v19, 0.0 }
 0x12c   : > { %v1190_v27 = vmax.f32 %v1117_v2, %v1186_v18  ;;  %v1187_v29 = vmax.f32 %v1181_v20, 0.0  ;;  %v1260_v36 = vmax.f32 %v1254_v24, 0.0 }
 0x12d   : > { %v1188_v31 = vmax.f32 %v1115_v5, %v1184_v23  ;;  %v1185_v33 = vmax.f32 %v1173_v25, 0.0  ;;  %v1258_v39 = vmax.f32 %v1246_v30, 0.0 }
 0x12e   : > { %v1263_v34 = vmax.f32 %v1190_v27, %v1259_v28  ;;  %v1191_v35 = vmax.f32 %v1118_v9, %v1187_v29 }
 0x12f   : > { %v1261_v37 = vmax.f32 %v1188_v31, %v1257_v32  ;;  %v1189_v38 = vmax.f32 %v1116_v13, %v1185_v33  ;;  %v1815_v40 = vpop.f32.mrb[28].mxu0  ;;  %v1823_v43 = vpop.f32.mrb[28].mxu1 }
 0x130   : > { %v1264_v41 = vmax.f32 %v1191_v35, %v1260_v36  ;;  %v1324_v42 = vadd.f32 %v1815_v40, %v2224_v58  ;;  %v1315_v44 = vpop.f32.mrb[29].mxu0  ;;  %v1397_v46 = vadd.f32 %v1823_v43, %v2224_v58  ;;  %v1388_v48 = vpop.f32.mrb[29].mxu1 }
 0x131   : > { %v1262_v45 = vmax.f32 %v1189_v38, %v1258_v39  ;;  %v1316_v47 = vadd.f32 %v1315_v44, %v2226_v59  ;;  %v1816_v49 = vpop.f32.mrb[30].mxu0  ;;  %v1389_v51 = vadd.f32 %v1388_v48, %v2226_v59  ;;  %v1824_v53 = vpop.f32.mrb[30].mxu1 }
 0x132   : > { %v1332_v50 = vmax.f32 %v1324_v42, 0.0  ;;  %v1327_v52 = vadd.f32 %v1816_v49, %v2228_v60  ;;  %v1318_v54 = vpop.f32.mrb[31].mxu0  ;;  %v1400_v56 = vadd.f32 %v1824_v53, %v2228_v60  ;;  %v1391_v61 = vpop.f32.mrb[31].mxu1  ;;  %v1405_v58 = vmax.f32 %v1397_v46, 0.0 }
 0x133   : > { %v1330_v55 = vmax.f32 %v1316_v47, 0.0  ;;  %v1319_v57 = vadd.f32 %v1318_v54, %v2230_v62  ;;  %v1392_v1 = vadd.f32 %v1391_v61, %v2230_v62  ;;  %v1403_v3 = vmax.f32 %v1389_v51, 0.0 }
 0x134   : > { %v1336_v63 = vmax.f32 %v1263_v34, %v1332_v50  ;;  %v1333_v0 = vmax.f32 %v1327_v52, 0.0  ;;  %v1406_v60 = vmax.f32 %v1400_v56, 0.0 }
 0x135   : > { %v1334_v2 = vmax.f32 %v1261_v37, %v1330_v55  ;;  %v1331_v59 = vmax.f32 %v1319_v57, 0.0  ;;  %v1404_v8 = vmax.f32 %v1392_v1, 0.0 }
 0x136   : > { %v1409_v4 = vmax.f32 %v1336_v63, %v1405_v58  ;;  %v1337_v5 = vmax.f32 %v1264_v41, %v1333_v0 }
 0x137   : > { %v1407_v6 = vmax.f32 %v1334_v2, %v1403_v3  ;;  %v1335_v7 = vmax.f32 %v1262_v45, %v1331_v59 }
 0x138   : > { %1414 = vst.msk [vmem:[%s185_s29 + $0x10] sm:$0xff] %vm1411_vm3, %v1409_v4  ;;  %v1410_v9 = vmax.f32 %v1337_v5, %v1406_v60 }
 0x139   : > { %1412 = vst.msk [vmem:[%s185_s29] sm:$0xff] %vm1411_vm3, %v1407_v6  ;;  %v1408_v62 = vmax.f32 %v1335_v7, %v1404_v8 }
 0x13a   : > { %1415 = vst.msk [vmem:[%s185_s29 + $0x18] sm:$0xff] %vm1411_vm3, %v1410_v9 }
 0x13b   : > { %1413 = vst.msk [vmem:[%s185_s29 + $0x8] sm:$0xff] %vm1411_vm3, %v1408_v62 }
 0x13c   : > { %1934 = shalt.err (!%p1931_p5)
}
 0x13d   : > { %s1935_s11 = scalar_lea.hbm %s2304_s6, 512  ;;  %s1939_s21 = scalar_lea.hbm %s2362_s3, 1024 }
 0x13e   : > { %p1936_p6 = scmp.ne.s32.totalorder %s2304_s6, %s1935_s11  ;;  %p1940_p10 = scmp.lt.u32.totalorder %s2304_s6, %s2362_s3 }
 0x13f   : > { %p1941_p11 = scmp.lt.u32.totalorder %s1939_s21, %s1935_s11  ;;  %p1943_p13 = scmp.lt.u32.totalorder %s1935_s11, %s2304_s6 }
 0x140   : > { %p1937_p7 = pnand %p1936_p6, %p2066_p4 }
 0x141   : > { %p1942_p12 = por %p1941_p11, %p1940_p10 }
 0x142   : > { %p1938_p9 = pneg %p1937_p7 }
 0x143   : > { %p1944_p0 = por %p1943_p13, %p1942_p12 }
 0x145   : > { %p1945_p1 = pnand %p1944_p0, %p1938_p9 }
 0x147   : > { %1948 = shalt.err (!%p1945_p1)
}
 0x148   : > { %s2004_s27 = smov 128   ;;  %s2005_s28 = smov 8  }
 0x149   : > { %1826 = dma.vmem_to_hbm [thread:$0]  (%p2066_p4), %s2306_s30, 512, %s2304_s6, %s2313_s15, %s2004_s27, %s2004_s27, %s2005_s28  }
 0x14a PF: > { %p1832_p2 = scmp.ge.s32.totalorder %s1999_s17, 2  ;;  %s1446_s29 = sand.u32 1, %s1979_s12  }
 0x14b   : > { %s1447_s4 = scalar_lea.sflag [#allocation3], %s1446_s29 }
 0x14c   : > { %p1829_p3 = pnand %p1832_p2, %p2073_p8 }
 0x14e   : > { %1974 = dma.done.wait (!%p1829_p3), %s1447_s4, 512  }
 0x14f   : > { %1976 = vsyncadd (!%p1829_p3), %s1447_s4, 4294966784  ;;  %s16_s17 = sadd.s32 1, %s1999_s17   ;;  %s2365_s12 = smov %s1983_s13 }
 0x150   : > { %p13_p5 = scmp.ge.s32.totalorder %s16_s17, 4   ;;  %s2366_s13 = smov %s1987_s14 }
 0x151   : > { %s2367_s14 = smov %s2079_s25  ;;  %s2368_s15 = smov %s1995_s16 }
 0x152   : > { %s2369_s16 = smov %s2371_s20  ;;  %15 = sbr.rel (!%p13_p5) target bundleno = 4 (0x4), region = 82 }
 0x159   :  { %1452 = vsyncpa [#allocation3], 1 }
 0x15a   :  { %1454 = vsyncpa [#allocation3 + $0x1], 1 }

</bundles_post_ra>
